<compile_context>
chip_gen: v6e
topology: v6e:2x2x1
jax: 0.10.0
libtpu: 0.0.40
codegen_flags: <defaults>
</compile_context>

<pallas_src>
import jax
import jax.numpy as jnp
from jax import lax
from jax.experimental import pallas as pl
from jax.experimental.pallas import tpu as pltpu


def _self_attention_kernel(x_ref, bias_ref, w1_ref, w2_ref, out_ref, pen_ref):
    # x_ref   : [BB, S, D] bf16 (cast once in the wrapper)
    # bias_ref: [BB, S]  f32 additive pad mask (-999999 at pad tokens)
    # w1_ref  : [D, U] bf16      w2_ref : [U, H] bf16
    # out_ref : [BB, H, D] f32   pen_ref: [1, 1, BB] f32 (lane-packed per-batch penalty)
    BB, S, D = x_ref.shape
    H = w2_ref.shape[1]

    xb = x_ref[...]                                   # bf16, no in-kernel cast
    x2 = xb.reshape(BB * S, D)                        # fold batch into MXU M dim

    # TODO(synk): nn.Dropout(p=0.5) is treated as identity (inference mode).
    y1 = jnp.tanh(jnp.dot(x2, w1_ref[...],
                          preferred_element_type=jnp.float32))            # [BB*S, U] f32
    z = jnp.dot(y1.astype(jnp.bfloat16), w2_ref[...],
                preferred_element_type=jnp.float32)                       # [BB*S, H] f32

    # bias broadcast over the hop axis; bias stays lane-dense [BB, S] in VMEM.
    scores = z.reshape(BB, S, H) + bias_ref[...][:, :, None]              # [BB, S, H]

    # Stable softmax over the sequence axis (axis=1); exact EUP reciprocal
    # (approx=False) because the penalty term squares attention errors.
    m = jnp.max(scores, axis=1, keepdims=True)        # [BB, 1, H]
    e = jnp.exp(scores - m)
    denom = jnp.sum(e, axis=1, keepdims=True)         # [BB, 1, H]
    att = e * pl.reciprocal(denom, approx=False)      # [BB, S, H] f32

    # out1[b] = att[b]^T @ x[b]: contract over S via dot_general (no materialized
    # transpose of the [S, H] tile).
    out = lax.dot_general(att.astype(jnp.bfloat16), xb,
                          dimension_numbers=(((1,), (1,)), ((0,), (0,))),
                          preferred_element_type=jnp.float32)             # [BB, H, D]
    out_ref[...] = out.astype(out_ref.dtype)

    # Penalization ||A A^T - I||_F per batch element, using
    #   ||AA^T - I||_F^2 = ||AA^T||_F^2 - 2*trace(AA^T) + H,  trace(AA^T) = ||A||_F^2
    # (no iota/eye construction).  aat kept in f32 — tiny [BB, H, H] matmul.
    aat = lax.dot_general(att, att,
                          dimension_numbers=(((1,), (1,)), ((0,), (0,))),
                          preferred_element_type=jnp.float32)             # [BB, H, H]
    fro = jnp.sum(jnp.sum(aat * aat, axis=2), axis=1)                     # [BB]
    tr = jnp.sum(jnp.sum(att * att, axis=2), axis=1)                      # [BB]
    pen_sq = fro - 2.0 * tr + jnp.float32(H)
    pen = jnp.sqrt(jnp.maximum(pen_sq, 0.0) + 1e-10)                      # [BB]
    pen_ref[...] = pen.reshape(1, 1, BB)              # lane-packed writeback


def _num_tensorcores():
    """v7x has 2 TensorCores per chip; v5e/v6e have 1."""
    try:
        kind = jax.devices()[0].device_kind.lower()
    except Exception:
        return 1
    return 2 if ("v7" in kind or "7x" in kind) else 1


def _pick_batch_block(B, S, D, U, H, n_cores, vmem_budget_bytes=24 << 20):
    """Largest legal batch block under a VMEM budget.

    Legality: BB divides B, and (BB == B or BB % 8 == 0) so the 2-D bias block
    (BB, S) keeps a sublane-legal second-minor dim.  On multi-TC chips (v7x) we
    prefer a grid extent that is a multiple of the core count so both cores get
    work; on single-TC chips (v5e/v6e) the whole batch in one step is best —
    per-grid-step overhead (~0.35 us) dominates at these shapes.
    """
    lane_h = 128  # H < 128 lane-pads to a full tile for elementwise intermediates
    per_b = (2 * S * D * 2          # x bf16, double-buffered
             + 2 * S * 4            # bias f32, double-buffered
             + 2 * H * D * 4        # out1 f32, double-buffered
             + S * U * 6            # y1 f32 + its bf16 cast
             + 4 * S * lane_h * 4   # scores/exp/att copies (lane-padded)
             + max(H, 8) * D * 4)   # out accumulator
    max_bb = max(1, int(vmem_budget_bytes // per_b))

    def legal(bb):
        return B % bb == 0 and (bb == B or bb % 8 == 0)

    cands = [bb for bb in range(1, B + 1) if legal(bb) and bb <= max_bb]
    if not cands:                                   # tiny budgets / odd B: ignore budget
        cands = [bb for bb in range(1, B + 1) if legal(bb)]
    if n_cores > 1:
        multi = [bb for bb in cands if (B // bb) % n_cores == 0]
        if multi:
            return max(multi)
    return max(cands)


def _vmem_limit_bytes(BB, S, D, U, H):
    """Conservative per-step VMEM estimate, clamped well inside v7x's 64 MiB."""
    lane_h = 128
    blk = (2 * BB * S * D * 2                      # x bf16, double-buffered
           + 2 * BB * S * 4                        # bias f32, double-buffered
           + 2 * BB * H * D * 4                    # out1 f32, double-buffered
           + 2 * 8 * 128 * 4                       # pen tile
           + 2 * (D * U * 2 + U * lane_h * 2)      # weights (w2 lane-padded)
           + BB * S * U * 6                        # y1 f32 + bf16 cast
           + 4 * BB * S * lane_h * 4               # scores/exp/att copies
           + BB * max(H, 8) * D * 4                # out accumulator
           + BB * 16 * 128 * 4)                    # aat
    return int(min(48 * 1024 * 1024, max(16 * 1024 * 1024, 2 * blk)))


def self_attention_forward(x, input_origin, w1, w2, attention_hops, *, batch_block=None):
    """x: [B, S, D] f32, input_origin: [B, S] int (0 = pad),
    w1: [D, U] f32 (= ws1.weight.T), w2: [U, H] f32 (= ws2.weight.T)."""
    B, S, D = x.shape
    U, H = w2.shape
    assert H == attention_hops and w1.shape == (D, U)

    n_cores = _num_tensorcores()
    BB = batch_block if batch_block is not None else _pick_batch_block(B, S, D, U, H, n_cores)
    assert B % BB == 0 and (BB == B or BB % 8 == 0)
    G = B // BB

    # Cast x to bf16 once in XLA (both in-kernel consumers are bf16 MXU operands);
    # halves the dominant HBM->VMEM payload and VMEM footprint.
    x_b = x.astype(jnp.bfloat16)
    # Additive pad-mask bias, lane-dense 2-D [B, S] f32 (broadcast over hops in-kernel).
    bias = jnp.where(input_origin == 0, jnp.float32(-999999.0), jnp.float32(0.0))
    # Weights cast to bf16 once; grid-invariant MXU operands (constant index_map).
    w1_b = w1.astype(jnp.bfloat16)
    w2_b = w2.astype(jnp.bfloat16)

    out1, pen = pl.pallas_call(
        _self_attention_kernel,
        out_shape=(
            jax.ShapeDtypeStruct((B, H, D), x.dtype),
            jax.ShapeDtypeStruct((G, 1, BB), jnp.float32),   # lane-packed penalties
        ),
        grid_spec=pltpu.PrefetchScalarGridSpec(
            num_scalar_prefetch=0,
            grid=(G,),
            in_specs=[
                pl.BlockSpec((BB, S, D), lambda b: (b, 0, 0)),   # x (bf16)
                pl.BlockSpec((BB, S), lambda b: (b, 0)),         # pad bias (f32)
                pl.BlockSpec((D, U), lambda b: (0, 0)),          # W1, fetched once
                pl.BlockSpec((U, H), lambda b: (0, 0)),          # W2, fetched once
            ],
            out_specs=[
                pl.BlockSpec((BB, H, D), lambda b: (b, 0, 0)),
                pl.BlockSpec((1, 1, BB), lambda b: (b, 0, 0)),
            ],
        ),
        compiler_params=pltpu.CompilerParams(
            # batch axis is independent -> megacore-shardable on v7x (grid kept even
            # there by _pick_batch_block); plain "parallel" is a no-op on v5e/v6e.
            dimension_semantics=("parallel",),
            vmem_limit_bytes=_vmem_limit_bytes(BB, S, D, U, H),
        ),
    )(x_b, bias, w1_b, w2_b)

    # Glue: reduce the per-batch penalties.  The reference divides by
    # self.I.size(0), which on the first forward of a fresh module is
    # attention_hops (self.I is still the 2-D identity at that point).
    penalty = jnp.sum(pen) / attention_hops
    return out1, penalty


def _reference_forward(x, input_origin, w1, w2, attention_hops):
    """Pure-JAX f32 reference mirroring the PyTorch forward (dropout = identity)."""
    y1 = jnp.tanh(jnp.einsum("bsd,du->bsu", x, w1))
    att = jnp.einsum("bsu,uh->bsh", y1, w2)
    att = jnp.transpose(att, (0, 2, 1))                     # [B, H, S]
    mask = (input_origin == 0).astype(jnp.float32)[:, None, :]
    att = att + (-999999.0) * mask
    att = jax.nn.softmax(att, axis=2)
    out1 = jnp.einsum("bhs,bsd->bhd", att, x)
    aat = jnp.einsum("bhs,bks->bhk", att, att)
    eye = jnp.eye(attention_hops, dtype=jnp.float32)[None]
    mat = aat - eye
    ret = jnp.sqrt(jnp.sum(mat ** 2, axis=(1, 2)) + 1e-10)
    penalty = jnp.sum(ret) / attention_hops                 # first-call semantics
    return out1, penalty


if __name__ == "__main__":
    # small, deterministic example (lane-friendly D so output stores are dense;
    # B chosen so a 2-TC split still yields a legal multiple-of-8 batch block)
    B, S, D = 16, 16, 128       # batch, sentence length, hidden dim
    U, HOPS = 128, 10           # attention_unit, attention_hops

    key = jax.random.PRNGKey(0)
    kx, kw1, kw2, ktok = jax.random.split(key, 4)

    x = jax.random.normal(kx, (B, S, D), dtype=jnp.float32)
    # ws1.weight: [U, D] -> pass transposed [D, U];  ws2.weight: [HOPS, U] -> [U, HOPS]
    w1 = (jax.random.normal(kw1, (U, D), dtype=jnp.float32) * 0.1).T
    w2 = (jax.random.normal(kw2, (HOPS, U), dtype=jnp.float32) * 0.1).T
    # token ids with some padding zeros at the tail
    tok = jax.random.randint(ktok, (B, S), minval=1, maxval=100, dtype=jnp.int32)
    tok = tok.at[:, -3:].set(0)   # pad positions

    out1, penalty = self_attention_forward(x, tok, w1, w2, HOPS)
    jax.block_until_ready((out1, penalty))

    ref_out1, ref_pen = _reference_forward(x, tok, w1, w2, HOPS)
    assert out1.shape == (B, HOPS, D)
    # Tolerance: MXU operands (x, weights, att) are bf16, so results differ from the
    # f32 reference at the ~1e-2 level.
    max_err = float(jnp.max(jnp.abs(out1 - ref_out1)))
    assert jnp.allclose(out1, ref_out1, atol=5e-2, rtol=5e-2), max_err
    assert jnp.allclose(penalty, ref_pen, atol=5e-2, rtol=5e-2), (float(penalty), float(ref_pen))

    print("KERNEL_OK")
</pallas_src>

<mosaic_0001>
module attributes {stable_mosaic.version = 11 : i64} {
  func.func @_self_attention_kernel(%arg0: i32, %arg1: memref<16x16x128xbf16, #tpu.memory_space<vmem>>, %arg2: memref<16x16xf32, #tpu.memory_space<vmem>>, %arg3: memref<128x128xbf16, #tpu.memory_space<vmem>>, %arg4: memref<128x10xbf16, #tpu.memory_space<vmem>>, %arg5: memref<16x10x128xf32, #tpu.memory_space<vmem>>, %arg6: memref<1x1x16xf32, #tpu.memory_space<vmem>>) attributes {dimension_semantics = [#tpu.dimension_semantics<parallel>], iteration_bounds = array<i64: 1>, scalar_prefetch = 0 : i64, scratch_operands = 0 : i64, tpu.core_type = #tpu.core_type<tc>, window_params = [{transform_indices = @transform_0, window_bounds = array<i64: 16, 16, 128>}, {transform_indices = @transform_1, window_bounds = array<i64: 16, 16>}, {pipeline_mode = #tpu.pipeline_mode<synchronous>, transform_indices = @transform_2, window_bounds = array<i64: 128, 128>}, {pipeline_mode = #tpu.pipeline_mode<synchronous>, transform_indices = @transform_3, window_bounds = array<i64: 128, 10>}, {transform_indices = @transform_4, window_bounds = array<i64: 16, 10, 128>}, {transform_indices = @transform_5, window_bounds = array<i64: 1, 1, 16>}]} {
    %c0 = arith.constant 0 : index
    %c0_0 = arith.constant 0 : index
    %c0_1 = arith.constant 0 : index
    %0 = vector.load %arg1[%c0, %c0_0, %c0_1] : memref<16x16x128xbf16, #tpu.memory_space<vmem>>, vector<16x16x128xbf16>
    %1 = vector.shape_cast %0 : vector<16x16x128xbf16> to vector<256x128xbf16>
    %c0_2 = arith.constant 0 : index
    %c0_3 = arith.constant 0 : index
    %2 = vector.load %arg3[%c0_2, %c0_3] : memref<128x128xbf16, #tpu.memory_space<vmem>>, vector<128x128xbf16>
    %cst = arith.constant dense<0.000000e+00> : vector<256x128xf32>
    %3 = tpu.matmul %1, %2, %cst {dimension_numbers = #tpu.dot_dimension_numbers<[1], [0], [0], [1], [0, 0, 1, 1], [], []>} : vector<256x128xbf16>, vector<128x128xbf16>, vector<256x128xf32> -> vector<256x128xf32>
    %4 = math.tanh %3 : vector<256x128xf32>
    %5 = arith.truncf %4 : vector<256x128xf32> to vector<256x128xbf16>
    %c0_4 = arith.constant 0 : index
    %c0_5 = arith.constant 0 : index
    %6 = vector.load %arg4[%c0_4, %c0_5] : memref<128x10xbf16, #tpu.memory_space<vmem>>, vector<128x10xbf16>
    %cst_6 = arith.constant dense<0.000000e+00> : vector<256x10xf32>
    %7 = tpu.matmul %5, %6, %cst_6 {dimension_numbers = #tpu.dot_dimension_numbers<[1], [0], [0], [1], [0, 0, 1, 1], [], []>} : vector<256x128xbf16>, vector<128x10xbf16>, vector<256x10xf32> -> vector<256x10xf32>
    %8 = vector.shape_cast %7 : vector<256x10xf32> to vector<16x16x10xf32>
    %c0_7 = arith.constant 0 : index
    %c0_8 = arith.constant 0 : index
    %9 = vector.load %arg2[%c0_7, %c0_8] : memref<16x16xf32, #tpu.memory_space<vmem>>, vector<16x16xf32>
    %10 = vector.shape_cast %9 : vector<16x16xf32> to vector<16x16x1xf32>
    %11 = vector.broadcast %10 : vector<16x16x1xf32> to vector<16x16x10xf32>
    %12 = arith.addf %8, %11 : vector<16x16x10xf32>
    %cst_9 = arith.constant dense<0xFF800000> : vector<16x10xf32>
    %13 = vector.multi_reduction <maximumf>, %12, %cst_9 [1] : vector<16x16x10xf32> to vector<16x10xf32>
    %14 = vector.shape_cast %13 : vector<16x10xf32> to vector<16x1x10xf32>
    %15 = vector.broadcast %14 : vector<16x1x10xf32> to vector<16x16x10xf32>
    %16 = arith.subf %12, %15 : vector<16x16x10xf32>
    %17 = math.exp %16 : vector<16x16x10xf32>
    %cst_10 = arith.constant dense<0.000000e+00> : vector<16x10xf32>
    %18 = vector.multi_reduction <add>, %17, %cst_10 [1] : vector<16x16x10xf32> to vector<16x10xf32>
    %19 = vector.shape_cast %18 : vector<16x10xf32> to vector<16x1x10xf32>
    %20 = tpu.reciprocal %19 : vector<16x1x10xf32> -> vector<16x1x10xf32>
    %21 = vector.broadcast %20 : vector<16x1x10xf32> to vector<16x16x10xf32>
    %22 = arith.mulf %17, %21 : vector<16x16x10xf32>
    %23 = arith.truncf %22 : vector<16x16x10xf32> to vector<16x16x10xbf16>
    %cst_11 = arith.constant dense<0.000000e+00> : vector<16x10x128xf32>
    %24 = tpu.matmul %23, %0, %cst_11 {dimension_numbers = #tpu.dot_dimension_numbers<[1], [1], [2], [2], [0, 0, 0, 2, 1, 2], [0], [0]>} : vector<16x16x10xbf16>, vector<16x16x128xbf16>, vector<16x10x128xf32> -> vector<16x10x128xf32>
    %c0_12 = arith.constant 0 : index
    %c0_13 = arith.constant 0 : index
    %c0_14 = arith.constant 0 : index
    %25 = vector.load %arg5[%c0_12, %c0_13, %c0_14] : memref<16x10x128xf32, #tpu.memory_space<vmem>>, vector<16x10x128xf32>
    tpu.vector_store %arg5[%c0_12, %c0_13, %c0_14], %24 {strides = array<i32>} : memref<16x10x128xf32, #tpu.memory_space<vmem>>, vector<16x10x128xf32>,
    %cst_15 = arith.constant dense<0.000000e+00> : vector<16x10x10xf32>
    %26 = tpu.matmul %22, %22, %cst_15 {dimension_numbers = #tpu.dot_dimension_numbers<[1], [1], [2], [2], [0, 0, 0, 2, 1, 2], [0], [0]>} : vector<16x16x10xf32>, vector<16x16x10xf32>, vector<16x10x10xf32> -> vector<16x10x10xf32>
    %27 = arith.mulf %26, %26 : vector<16x10x10xf32>
    %cst_16 = arith.constant dense<0.000000e+00> : vector<16x10xf32>
    %28 = vector.multi_reduction <add>, %27, %cst_16 [2] : vector<16x10x10xf32> to vector<16x10xf32>
    %cst_17 = arith.constant dense<0.000000e+00> : vector<16xf32>
    %29 = vector.multi_reduction <add>, %28, %cst_17 [1] : vector<16x10xf32> to vector<16xf32>
    %30 = arith.mulf %22, %22 : vector<16x16x10xf32>
    %cst_18 = arith.constant dense<0.000000e+00> : vector<16x16xf32>
    %31 = vector.multi_reduction <add>, %30, %cst_18 [2] : vector<16x16x10xf32> to vector<16x16xf32>
    %cst_19 = arith.constant dense<0.000000e+00> : vector<16xf32>
    %32 = vector.multi_reduction <add>, %31, %cst_19 [1] : vector<16x16xf32> to vector<16xf32>
    %cst_20 = arith.constant 2.000000e+00 : f32
    %33 = vector.broadcast %cst_20 : f32 to vector<16xf32>
    %34 = arith.mulf %33, %32 : vector<16xf32>
    %35 = arith.subf %29, %34 : vector<16xf32>
    %cst_21 = arith.constant 1.000000e+01 : f32
    %36 = vector.broadcast %cst_21 : f32 to vector<16xf32>
    %37 = arith.addf %35, %36 : vector<16xf32>
    %cst_22 = arith.constant 0.000000e+00 : f32
    %38 = vector.broadcast %cst_22 : f32 to vector<16xf32>
    %39 = arith.maximumf %37, %38 : vector<16xf32>
    %cst_23 = arith.constant 1.000000e-10 : f32
    %40 = vector.broadcast %cst_23 : f32 to vector<16xf32>
    %41 = arith.addf %39, %40 : vector<16xf32>
    %42 = math.sqrt %41 : vector<16xf32>
    %43 = vector.shape_cast %42 : vector<16xf32> to vector<1x1x16xf32>
    %c0_24 = arith.constant 0 : index
    %c0_25 = arith.constant 0 : index
    %c0_26 = arith.constant 0 : index
    %44 = vector.load %arg6[%c0_24, %c0_25, %c0_26] : memref<1x1x16xf32, #tpu.memory_space<vmem>>, vector<1x1x16xf32>
    tpu.vector_store %arg6[%c0_24, %c0_25, %c0_26], %43 {strides = array<i32>} : memref<1x1x16xf32, #tpu.memory_space<vmem>>, vector<1x1x16xf32>,
    return
  }
  func.func @transform_0(%arg0: i32) -> (i32, i32, i32) {
    %c0_i32 = arith.constant 0 : i32
    %c0_i32_0 = arith.constant 0 : i32
    %c0_i32_1 = arith.constant 0 : i32
    return %arg0, %c0_i32, %c0_i32_0 : i32, i32, i32
  }
  func.func @transform_1(%arg0: i32) -> (i32, i32) {
    %c0_i32 = arith.constant 0 : i32
    %c0_i32_0 = arith.constant 0 : i32
    return %arg0, %c0_i32 : i32, i32
  }
  func.func @transform_2(%arg0: i32) -> (i32, i32) {
    %c0_i32 = arith.constant 0 : i32
    %c0_i32_0 = arith.constant 0 : i32
    %c0_i32_1 = arith.constant 0 : i32
    return %c0_i32, %c0_i32_0 : i32, i32
  }
  func.func @transform_3(%arg0: i32) -> (i32, i32) {
    %c0_i32 = arith.constant 0 : i32
    %c0_i32_0 = arith.constant 0 : i32
    %c0_i32_1 = arith.constant 0 : i32
    return %c0_i32, %c0_i32_0 : i32, i32
  }
  func.func @transform_4(%arg0: i32) -> (i32, i32, i32) {
    %c0_i32 = arith.constant 0 : i32
    %c0_i32_0 = arith.constant 0 : i32
    %c0_i32_1 = arith.constant 0 : i32
    return %arg0, %c0_i32, %c0_i32_0 : i32, i32, i32
  }
  func.func @transform_5(%arg0: i32) -> (i32, i32, i32) {
    %c0_i32 = arith.constant 0 : i32
    %c0_i32_0 = arith.constant 0 : i32
    %c0_i32_1 = arith.constant 0 : i32
    return %arg0, %c0_i32, %c0_i32_0 : i32, i32, i32
  }
}

</mosaic_0001>

<bundles_post_ra>
// kernel: tpu_custom_call.1
= control target key start
LH: loop header
LB: loop body
LE: loop exit
PB: predicated region body
PF: predicated region fallthrough
CT: control target
= control target key end

     0   :  { %11 = vsyncpa [#allocation3], 0  ;;  %s6896_s0 = inlined_call_operand.hbm [shape: bf16[16,16,128], index: 0, kind: input, shape index: {}]   ;;  %s6897_s1 = inlined_call_operand.hbm [shape: f32[16,16], index: 1, kind: input, shape index: {}]   ;;  %s6898_s2 = inlined_call_operand.vmem [shape: bf16[128,128], index: 2, kind: input, shape index: {}]   ;;  %s6899_s3 = inlined_call_operand.vmem [shape: bf16[128,10], index: 3, kind: input, shape index: {}]   ;;  %s6900_s4 = inlined_call_operand.vmem [shape: f32[16,10,128], index: 4, kind: output, shape index: {0}]   ;;  %s6901_s5 = inlined_call_operand.hbm [shape: f32[1,1,16], index: 5, kind: output, shape index: {1}]  }
   0x1   :  { %12 = vsyncpa [#allocation6], 0 }
   0x2   :  { %13 = vsyncpa [#allocation4], 0  ;;  %s5673_s18 = smov [#allocation2]  }
   0x3   :  { %s19_s19 = sshll.u32 %s5673_s18, 4  ;;  %s20_s19 = int_to_ptr.vmem [resolvable:$true] %s19_s19 }
   0x4   :  { %s5615_s20 = scalar_lea.vmem %s20_s19, 2048  ;;  %p5620_p1 = scmp.lt.s32.totalorder %s20_s19, %s20_s19 }
   0x5   :  { %p5616_p0 = scmp.ne.s32.totalorder %s20_s19, %s5615_s20  ;;  %p5621_p2 = scmp.lt.s32.totalorder %s5615_s20, %s5615_s20 }
   0x7   :  { %p5622_p3 = por %p5621_p2, %p5620_p1 }
   0x9   :  { %p5623_p4 = pnand %p5622_p3, %p5616_p0 }
   0xb   :  { %5626 = shalt.err (!%p5623_p4)
}
   0xc   :  { %s5674_s21 = smov 64   ;;  %s5675_s22 = smov 4  }
   0xd   :  { %25 = dma.hbm_to_vmem [thread:$0]  %s6896_s0, 2048, %s20_s19, [#allocation3], %s5674_s21, %s5674_s21, %s5675_s22  }
   0xe   :  { %s5676_s25 = smov [#allocation5]  }
   0xf   :  { %s31_s26 = sshll.u32 %s5676_s25, 4  ;;  %s32_s26 = int_to_ptr.vmem [resolvable:$true] %s31_s26 }
  0x10   :  { %s5635_s27 = scalar_lea.vmem %s32_s26, 256  ;;  %p5640_p6 = scmp.lt.s32.totalorder %s32_s26, %s32_s26 }
  0x11   :  { %p5636_p5 = scmp.ne.s32.totalorder %s32_s26, %s5635_s27  ;;  %p5641_p7 = scmp.lt.s32.totalorder %s5635_s27, %s5635_s27 }
  0x13   :  { %p5642_p8 = por %p5641_p7, %p5640_p6 }
  0x15   :  { %p5643_p9 = pnand %p5642_p8, %p5636_p5 }
  0x17   :  { %5646 = shalt.err (!%p5643_p9)
}
  0x18   :  { %s5677_s28 = smov 128   ;;  %s5678_s29 = smov 8  }
  0x19   :  { %37 = dma.hbm_to_vmem [thread:$0]  %s6897_s1, 256, %s32_s26, [#allocation6], %s5677_s28, %s5677_s28, %s5678_s29  }
  0x1a   :  { %5667 = dma.done.wait [#allocation3], 2048  }
  0x1b   :  { %5668 = vsyncadd [#allocation3], 4294965248 }
  0x1c   :  { %5669 = dma.done.wait [#allocation6], 256  }
  0x1d   :  { %5670 = vsyncadd [#allocation6], 4294967040  ;;  %v5395_v0 = vld [vmem:[%s6898_s2 + $0x38] sm:$0xff]   ;;  %v5396_v1 = vld [vmem:[%s6898_s2 + $0x30] sm:$0xff]   ;;  %v677_v32 = vlaneseq  ;;  %vm885_vm0 = vcmask 80896   ;;  %vm5680_vm1 = vmmov 0  }
  0x1e   :  { %5081 = vmatprep.subr.bf16.mxu0 %v5395_v0  ;;  %v5397_v2 = vld [vmem:[%s6898_s2 + $0x28] sm:$0xff]   ;;  %v5398_v3 = vld [vmem:[%s6898_s2 + $0x20] sm:$0xff]   ;;  %v5399_v5 = vld [vmem:[%s6898_s2 + $0x18] sm:$0xff]   ;;  %vm1350_vm2 = vcmask 130048   ;;  %vm4170_vm3 = vcmask 74752   ;;  %vm4307_vm4 = vcmask 130112  }
  0x1f   :  { %5082 = vmatpush3.bf16.msra.mxu0 %v5395_v0  ;;  %v5403_v4 = vld [vmem:[#allocation2] sm:$0xff]   ;;  %v5400_v6 = vld [vmem:[%s6898_s2 + $0x10] sm:$0xff]   ;;  %v5401_v7 = vld [vmem:[%s6898_s2 + $0x8] sm:$0xff]   ;;  %v5766_v33 = vshrl.u32 %v677_v32, 7  ;;  %v4297_v34 = vand.u32 127, %v677_v32  ;;  %vm4444_vm5 = vcmask 1041409  }
  0x20   :  { %5083 = vmatprep.subr.bf16.mxu0 %v5396_v1  ;;  %5097 = vmatprep.mubr.bf16.mxu0 %v5403_v4  ;;  %v5402_v8 = vld [vmem:[%s6898_s2] sm:$0xff]   ;;  %v5419_v9 = vld [vmem:[%s6899_s3 + $0x38] sm:$0xff]   ;;  %v5420_v10 = vld [vmem:[%s6899_s3 + $0x30] sm:$0xff]   ;;  %vm4446_vm6 = vcmask 1042434   ;;  %vm4448_vm7 = vcmask 1043459   ;;  %vm4450_vm8 = vcmask 1044484  }
  0x21   :  { %5129 = vmatprep.subr.bf16.mxu1 %v5419_v9  ;;  %v5404_v11 = vld [vmem:[#allocation2 + $0x8] sm:$0xff]   ;;  %v5405_v12 = vld [vmem:[#allocation2 + $0x10] sm:$0xff]   ;;  %v5406_v13 = vld [vmem:[#allocation2 + $0x18] sm:$0xff]   ;;  %v690_v36 = vsub.s32 1, %v5766_v33  ;;  %v5770_v37 = vsub.s32 %v4297_v34, %v5766_v33  ;;  %v4302_v38 = vadd.s32 4294967288, %v4297_v34  ;;  %v679_v39 = vsub.s32 0, %v5766_v33 }
  0x22   :  { %5130 = vmatpush3.bf16.msra.mxu1 %v5419_v9  ;;  %v5407_v14 = vld [vmem:[#allocation2 + $0x20] sm:$0xff]   ;;  %v5408_v15 = vld [vmem:[#allocation2 + $0x28] sm:$0xff]   ;;  %v5409_v16 = vld [vmem:[#allocation2 + $0x30] sm:$0xff]   ;;  %v701_v43 = vsub.s32 2, %v5766_v33  ;;  %v712_v45 = vsub.s32 3, %v5766_v33  ;;  %v723_v47 = vsub.s32 4, %v5766_v33 }
  0x23   :  { %5084 = vmatpush3.bf16.msra.mxu0 %v5396_v1  ;;  %5131 = vmatprep.subr.bf16.mxu1 %v5420_v10  ;;  %v5410_v17 = vld [vmem:[#allocation2 + $0x38] sm:$0xff]   ;;  %v5411_v18 = vld [vmem:[#allocation2 + $0x40] sm:$0xff]   ;;  %v5412_v19 = vld [vmem:[#allocation2 + $0x48] sm:$0xff]   ;;  %v5774_v41 = vsub.s32 %v4302_v38, %v5766_v33  ;;  %v734_v49 = vsub.s32 5, %v5766_v33  ;;  %v745_v51 = vsub.s32 6, %v5766_v33  ;;  %v756_v53 = vsub.s32 7, %v5766_v33 }
  0x24   :  { %5085 = vmatprep.subr.bf16.mxu0 %v5397_v2  ;;  %v5413_v20 = vld [vmem:[#allocation2 + $0x50] sm:$0xff]   ;;  %v5414_v21 = vld [vmem:[#allocation2 + $0x58] sm:$0xff]   ;;  %v5415_v22 = vld [vmem:[#allocation2 + $0x60] sm:$0xff]   ;;  %vm4452_vm9 = vcmask 1045509   ;;  %vm4454_vm10 = vcmask 1046534   ;;  %vm4456_vm11 = vcmask 1047559  }
  0x25   :  { %v5416_v23 = vld [vmem:[#allocation2 + $0x68] sm:$0xff]   ;;  %v5417_v24 = vld [vmem:[#allocation2 + $0x70] sm:$0xff]   ;;  %v5418_v25 = vld [vmem:[#allocation2 + $0x78] sm:$0xff]  }
  0x26   :  { %5132 = vmatpush3.bf16.msra.mxu1 %v5420_v10  ;;  %v5421_v26 = vld [vmem:[%s6899_s3 + $0x28] sm:$0xff]   ;;  %v5422_v27 = vld [vmem:[%s6899_s3 + $0x20] sm:$0xff]   ;;  %v5423_v28 = vld [vmem:[%s6899_s3 + $0x18] sm:$0xff]  }
  0x27   :  { %5086 = vmatpush3.bf16.msra.mxu0 %v5397_v2  ;;  %5133 = vmatprep.subr.bf16.mxu1 %v5421_v26  ;;  %v5424_v29 = vld [vmem:[%s6899_s3 + $0x10] sm:$0xff]   ;;  %v5425_v30 = vld [vmem:[%s6899_s3 + $0x8] sm:$0xff]   ;;  %v5426_v31 = vld [vmem:[%s6899_s3] sm:$0xff]  }
  0x28   :  { %5087 = vmatprep.subr.bf16.mxu0 %v5398_v3  ;;  %v675_v35 = vld [vmem:[#allocation5] sm:$0xff]  ;;  %v676_v55 = vld [vmem:[#allocation5 + $0x8] sm:$0xff] }
  0x29   :  { %v691_v40 = vrot.slane %v675_v35, %v690_v36  ;;  %v680_v42 = vrot.slane %v675_v35, %v679_v39  ;;  %v702_v44 = vrot.slane %v675_v35, %v701_v43  ;;  %v713_v46 = vrot.slane %v675_v35, %v712_v45 }
  0x2a   :  { %5134 = vmatpush3.bf16.msra.mxu1 %v5421_v26  ;;  %v724_v48 = vrot.slane %v675_v35, %v723_v47  ;;  %v735_v50 = vrot.slane %v675_v35, %v734_v49  ;;  %v746_v52 = vrot.slane %v675_v35, %v745_v51  ;;  %v757_v54 = vrot.slane %v675_v35, %v756_v53 }
  0x2b   :  { %5088 = vmatpush3.bf16.msra.mxu0 %v5398_v3  ;;  %5135 = vmatprep.subr.bf16.mxu1 %v5422_v27  ;;  %v768_v56 = vrot.slane %v676_v55, %v679_v39  ;;  %v779_v57 = vrot.slane %v676_v55, %v690_v36  ;;  %v790_v58 = vrot.slane %v676_v55, %v701_v43 }
  0x2c   :  { %5089 = vmatprep.subr.bf16.mxu0 %v5399_v5  ;;  %693 = vbcast.lane.b32.xlu1 %v691_v40, 256  ;;  %v801_v59 = vrot.slane %v676_v55, %v712_v45  ;;  %v812_v60 = vrot.slane %v676_v55, %v723_v47  ;;  %v823_v62 = vrot.slane %v676_v55, %v734_v49 }
  0x2d   :  { %682 = vbcast.lane.b32.xlu0 %v680_v42, 256  ;;  %v834_v1 = vrot.slane %v676_v55, %v745_v51  ;;  %v845_v4 = vrot.slane %v676_v55, %v756_v53 }
  0x2e   :  { %5136 = vmatpush3.bf16.msra.mxu1 %v5422_v27 }
  0x2f   :  { %5090 = vmatpush3.bf16.msra.mxu0 %v5399_v5  ;;  %5137 = vmatprep.subr.bf16.mxu1 %v5423_v28 }
  0x30   :  { %5091 = vmatprep.subr.bf16.mxu0 %v5400_v6  ;;  %697 = vbcast.lane.b32.xlu1 %v691_v40, 264 }
  0x31   :  { %686 = vbcast.lane.b32.xlu0 %v680_v42, 264 }
  0x32   :  { %5138 = vmatpush3.bf16.msra.mxu1 %v5423_v28 }
  0x33   :  { %5092 = vmatpush3.bf16.msra.mxu0 %v5400_v6  ;;  %5139 = vmatprep.subr.bf16.mxu1 %v5424_v29 }
  0x34   :  { %5093 = vmatprep.subr.bf16.mxu0 %v5401_v7  ;;  %708 = vbcast.lane.b32.xlu1 %v702_v44, 264 }
  0x35   :  { %704 = vbcast.lane.b32.xlu0 %v702_v44, 256 }
  0x36   :  { %5140 = vmatpush3.bf16.msra.mxu1 %v5424_v29 }
  0x37   :  { %5094 = vmatpush3.bf16.msra.mxu0 %v5401_v7  ;;  %5141 = vmatprep.subr.bf16.mxu1 %v5425_v30 }
  0x38   :  { %5095 = vmatprep.subr.bf16.mxu0 %v5402_v8  ;;  %719 = vbcast.lane.b32.xlu1 %v713_v46, 264 }
  0x39   :  { %715 = vbcast.lane.b32.xlu0 %v713_v46, 256 }
  0x3a   :  { %5142 = vmatpush3.bf16.msra.mxu1 %v5425_v30 }
  0x3b   :  { %5096 = vmatpush3.bf16.msra.mxu0 %v5402_v8  ;;  %5143 = vmatprep.subr.bf16.mxu1 %v5426_v31 }
  0x3c   :  { %730 = vbcast.lane.b32.xlu1 %v724_v48, 264 }
  0x3d   :  { %726 = vbcast.lane.b32.xlu0 %v724_v48, 256 }
  0x3e   :  { %5098 = vmatmul.mubr.bf16.vlgmr.msra.gmra.mxu0 %v5404_v11  ;;  %5144 = vmatpush3.bf16.msra.mxu1 %v5426_v31 }
  0x3f   :  { %5101 = vmatprep.mubr.bf16.mxu0 %v5405_v12 }
  0x40   :  { %741 = vbcast.lane.b32.xlu1 %v735_v50, 264 }
  0x41   :  { %737 = vbcast.lane.b32.xlu0 %v735_v50, 256 }
  0x44   :  { %752 = vbcast.lane.b32.xlu1 %v746_v52, 264 }
  0x45   :  { %748 = vbcast.lane.b32.xlu0 %v746_v52, 256 }
  0x46   :  { %5102 = vmatmul.mubr.bf16.gmra.mxu0 %v5406_v13 }
  0x47   :  { %5105 = vmatprep.mubr.bf16.mxu0 %v5407_v14 }
  0x48   :  { %763 = vbcast.lane.b32.xlu1 %v757_v54, 264 }
  0x49   :  { %759 = vbcast.lane.b32.xlu0 %v757_v54, 256 }
  0x4c   :  { %774 = vbcast.lane.b32.xlu1 %v768_v56, 264 }
  0x4d   :  { %770 = vbcast.lane.b32.xlu0 %v768_v56, 256 }
  0x4e   :  { %5106 = vmatmul.mubr.bf16.gmra.mxu0 %v5408_v15 }
  0x4f   :  { %5109 = vmatprep.mubr.bf16.mxu0 %v5409_v16 }
  0x50   :  { %785 = vbcast.lane.b32.xlu1 %v779_v57, 264 }
  0x51   :  { %781 = vbcast.lane.b32.xlu0 %v779_v57, 256 }
  0x54   :  { %796 = vbcast.lane.b32.xlu1 %v790_v58, 264 }
  0x55   :  { %792 = vbcast.lane.b32.xlu0 %v790_v58, 256 }
  0x56   :  { %5110 = vmatmul.mubr.bf16.gmra.mxu0 %v5410_v17 }
  0x57   :  { %5113 = vmatprep.mubr.bf16.mxu0 %v5411_v18 }
  0x58   :  { %807 = vbcast.lane.b32.xlu1 %v801_v59, 264 }
  0x59   :  { %803 = vbcast.lane.b32.xlu0 %v801_v59, 256 }
  0x5c   :  { %818 = vbcast.lane.b32.xlu1 %v812_v60, 264 }
  0x5d   :  { %814 = vbcast.lane.b32.xlu0 %v812_v60, 256 }
  0x5e   :  { %5114 = vmatmul.mubr.bf16.gmra.mxu0 %v5412_v19 }
  0x5f   :  { %5117 = vmatprep.mubr.bf16.mxu0 %v5413_v20 }
  0x60   :  { %829 = vbcast.lane.b32.xlu1 %v823_v62, 264 }
  0x61   :  { %825 = vbcast.lane.b32.xlu0 %v823_v62, 256 }
  0x64   :  { %840 = vbcast.lane.b32.xlu1 %v834_v1, 264 }
  0x65   :  { %836 = vbcast.lane.b32.xlu0 %v834_v1, 256 }
  0x66   :  { %5118 = vmatmul.mubr.bf16.gmra.mxu0 %v5414_v21 }
  0x67   :  { %5121 = vmatprep.mubr.bf16.mxu0 %v5415_v22 }
  0x68   :  { %851 = vbcast.lane.b32.xlu1 %v845_v4, 264 }
  0x69   :  { %847 = vbcast.lane.b32.xlu0 %v845_v4, 256 }
  0x6e   :  { %5122 = vmatmul.mubr.bf16.gmra.mxu0 %v5416_v23 }
  0x6f   :  { %5125 = vmatprep.mubr.bf16.mxu0 %v5417_v24 }
  0x76   :  { %5126 = vmatmul.mubr.bf16.gmra.mxu0 %v5418_v25 }
  0xfe   :  { %v5099_v61 = vpop.f32.mrf.mxu0 }
 0x100   :  { %v275_v63 = vpop.f32.mrf.mxu0 }
 0x101   :  { %5427 = vtanh.f32 %v275_v63 }
 0x102   :  { %v5100_v0 = vpop.f32.mrf.mxu0 }
 0x103   :  { %5429 = vtanh.f32 %v5100_v0 }
 0x104   :  { %v278_v2 = vpop.f32.mrf.mxu0 }
 0x105   :  { %5431 = vtanh.f32 %v278_v2 }
 0x106   :  { %5433 = vtanh.f32 %v5099_v61  ;;  %v5103_v3 = vpop.f32.mrf.mxu0 }
 0x107   :  { %5435 = vtanh.f32 %v5103_v3 }
 0x108   :  { %v291_v5 = vpop.f32.mrf.mxu0 }
 0x109   :  { %5437 = vtanh.f32 %v291_v5 }
 0x10a   :  { %v5104_v6 = vpop.f32.mrf.mxu0 }
 0x10b   :  { %5439 = vtanh.f32 %v5104_v6 }
 0x10c   :  { %v294_v7 = vpop.f32.mrf.mxu0 }
 0x10d   :  { %5441 = vtanh.f32 %v294_v7 }
 0x10e   :  { %v5107_v8 = vpop.f32.mrf.mxu0  ;;  %v5428_v9 = vpop.eup %5427 }
 0x10f   :  { %5443 = vtanh.f32 %v5107_v8 }
 0x110   :  { %v307_v10 = vpop.f32.mrf.mxu0  ;;  %v5430_v11 = vpop.eup %5429 }
 0x111   :  { %5445 = vtanh.f32 %v307_v10 }
 0x112   :  { %v5432_v12 = vpop.eup %5431  ;;  %v5108_v13 = vpop.f32.mrf.mxu0 }
 0x113   :  { %v5434_v14 = vpop.eup %5433  ;;  %5447 = vtanh.f32 %v5108_v13  ;;  %v434_v15 = vpack.c.bf16 %v5432_v12, %v5428_v9 }
 0x114   :  { %v310_v16 = vpop.f32.mrf.mxu0  ;;  %v435_v17 = vpack.c.bf16 %v5430_v11, %v5434_v14  ;;  %v5436_v18 = vpop.eup %5435 }
 0x115   :  { %5449 = vtanh.f32 %v310_v16  ;;  %5145 = vmatprep.mubr.bf16.mxu1 %v434_v15 }
 0x116   :  { %v5111_v19 = vpop.f32.mrf.mxu0  ;;  %5146 = vmatmul.mubr.bf16.vlgmr.msra.gmra.mxu1 %v435_v17  ;;  %v5438_v20 = vpop.eup %5437 }
 0x117   :  { %5451 = vtanh.f32 %v5111_v19  ;;  %v694_v19 = vpop.permute.xlu1 %693 }
 0x118   :  { %v5440_v21 = vpop.eup %5439  ;;  %v323_v22 = vpop.f32.mrf.mxu0 }
 0x119   :  { %5453 = vtanh.f32 %v323_v22  ;;  %v437_v25 = vpack.c.bf16 %v5440_v21, %v5436_v18  ;;  %v683_v18 = vpop.permute.xlu0 %682 }
 0x11a   :  { %v5442_v23 = vpop.eup %5441  ;;  %v5112_v24 = vpop.f32.mrf.mxu0 }
 0x11b   :  { %5455 = vtanh.f32 %v5112_v24  ;;  %v436_v26 = vpack.c.bf16 %v5442_v23, %v5438_v20  ;;  %v698_v21 = vpop.permute.xlu1 %697 }
 0x11c   :  { %v326_v27 = vpop.f32.mrf.mxu0  ;;  %v5444_v28 = vpop.eup %5443 }
 0x11d   :  { %5457 = vtanh.f32 %v326_v27  ;;  %5149 = vmatprep.mubr.bf16.mxu1 %v436_v26  ;;  %v687_v20 = vpop.permute.xlu0 %686 }
 0x11e   :  { %v5115_v29 = vpop.f32.mrf.mxu0  ;;  %5150 = vmatmul.mubr.bf16.gmra.mxu1 %v437_v25  ;;  %v5446_v30 = vpop.eup %5445 }
 0x11f   :  { %5459 = vtanh.f32 %v5115_v29  ;;  %v709_v27 = vpop.permute.xlu1 %708 }
 0x120   :  { %v5448_v31 = vpop.eup %5447  ;;  %v339_v32 = vpop.f32.mrf.mxu0 }
 0x121   :  { %5461 = vtanh.f32 %v339_v32  ;;  %v439_v35 = vpack.c.bf16 %v5448_v31, %v5444_v28  ;;  %v705_v23 = vpop.permute.xlu0 %704 }
 0x122   :  { %v5450_v33 = vpop.eup %5449  ;;  %v5116_v34 = vpop.f32.mrf.mxu0 }
 0x123   :  { %5463 = vtanh.f32 %v5116_v34  ;;  %v438_v36 = vpack.c.bf16 %v5450_v33, %v5446_v30 }
 0x124   :  { %v342_v38 = vpop.f32.mrf.mxu0  ;;  %v5452_v39 = vpop.eup %5451 }
 0x125   :  { %5465 = vtanh.f32 %v342_v38  ;;  %5153 = vmatprep.mubr.bf16.mxu1 %v438_v36  ;;  %v716_v31 = vpop.permute.xlu0 %715 }
 0x126   :  { %5154 = vmatmul.mubr.bf16.gmra.mxu1 %v439_v35  ;;  %v5119_v40 = vpop.f32.mrf.mxu0  ;;  %v5454_v42 = vpop.eup %5453 }
 0x127   :  { %5467 = vtanh.f32 %v5119_v40 }
 0x128   :  { %v5456_v43 = vpop.eup %5455  ;;  %v355_v44 = vpop.f32.mrf.mxu0 }
 0x129   :  { %v441_v46 = vpack.c.bf16 %v5456_v43, %v5452_v39  ;;  %5469 = vtanh.f32 %v355_v44 }
 0x12a   :  { %v5458_v45 = vpop.eup %5457  ;;  %v5120_v47 = vpop.f32.mrf.mxu0 }
 0x12b   :  { %v440_v48 = vpack.c.bf16 %v5458_v45, %v5454_v42  ;;  %5471 = vtanh.f32 %v5120_v47  ;;  %v720_v45 = vpop.permute.xlu1 %719 }
 0x12c   :  { %v358_v49 = vpop.f32.mrf.mxu0  ;;  %v5460_v50 = vpop.eup %5459 }
 0x12d   :  { %5157 = vmatprep.mubr.bf16.mxu1 %v440_v48  ;;  %5473 = vtanh.f32 %v358_v49 }
 0x12e   :  { %5158 = vmatmul.mubr.bf16.gmra.mxu1 %v441_v46  ;;  %v5123_v51 = vpop.f32.mrf.mxu0  ;;  %v5462_v52 = vpop.eup %5461 }
 0x12f   :  { %5475 = vtanh.f32 %v5123_v51 }
 0x130   :  { %v5464_v53 = vpop.eup %5463  ;;  %v371_v54 = vpop.f32.mrf.mxu0 }
 0x131   :  { %v443_v56 = vpack.c.bf16 %v5464_v53, %v5460_v50  ;;  %5477 = vtanh.f32 %v371_v54 }
 0x132   :  { %v5466_v55 = vpop.eup %5465  ;;  %v5124_v57 = vpop.f32.mrf.mxu0 }
 0x133   :  { %v442_v58 = vpack.c.bf16 %v5466_v55, %v5462_v52  ;;  %5479 = vtanh.f32 %v5124_v57  ;;  %v727_v55 = vpop.permute.xlu0 %726 }
 0x134   :  { %v374_v59 = vpop.f32.mrf.mxu0  ;;  %v5468_v60 = vpop.eup %5467 }
 0x135   :  { %5161 = vmatprep.mubr.bf16.mxu1 %v442_v58  ;;  %5481 = vtanh.f32 %v374_v59 }
 0x136   :  { %5162 = vmatmul.mubr.bf16.gmra.mxu1 %v443_v56  ;;  %v5127_v61 = vpop.f32.mrf.mxu0  ;;  %v5470_v62 = vpop.eup %5469 }
 0x137   :  { %5483 = vtanh.f32 %v5127_v61 }
 0x138   :  { %v5472_v63 = vpop.eup %5471  ;;  %v387_v0 = vpop.f32.mrf.mxu0 }
 0x139   :  { %v445_v2 = vpack.c.bf16 %v5472_v63, %v5468_v60  ;;  %5485 = vtanh.f32 %v387_v0  ;;  %v731_v0 = vpop.permute.xlu1 %730 }
 0x13a   :  { %v5474_v1 = vpop.eup %5473  ;;  %v5128_v3 = vpop.f32.mrf.mxu0 }
 0x13b   :  { %v444_v4 = vpack.c.bf16 %v5474_v1, %v5470_v62  ;;  %5487 = vtanh.f32 %v5128_v3 }
 0x13c   :  { %v390_v5 = vpop.f32.mrf.mxu0  ;;  %v5476_v6 = vpop.eup %5475 }
 0x13d   :  { %5165 = vmatprep.mubr.bf16.mxu1 %v444_v4  ;;  %5489 = vtanh.f32 %v390_v5 }
 0x13e   :  { %5166 = vmatmul.mubr.bf16.gmra.mxu1 %v445_v2  ;;  %v5478_v7 = vpop.eup %5477 }
 0x140   :  { %v5480_v8 = vpop.eup %5479 }
 0x141   :  { %v447_v10 = vpack.c.bf16 %v5480_v8, %v5476_v6  ;;  %v738_v6 = vpop.permute.xlu0 %737 }
 0x142   :  { %v5482_v9 = vpop.eup %5481 }
 0x143   :  { %v446_v11 = vpack.c.bf16 %v5482_v9, %v5478_v7 }
 0x144   :  { %v5484_v12 = vpop.eup %5483 }
 0x145   :  { %5169 = vmatprep.mubr.bf16.mxu1 %v446_v11 }
 0x146   :  { %5170 = vmatmul.mubr.bf16.gmra.mxu1 %v447_v10  ;;  %v5486_v13 = vpop.eup %5485 }
 0x148   :  { %v5488_v14 = vpop.eup %5487 }
 0x149   :  { %v449_v16 = vpack.c.bf16 %v5488_v14, %v5484_v12 }
 0x14a   :  { %v5490_v15 = vpop.eup %5489 }
 0x14b   :  { %v448_v17 = vpack.c.bf16 %v5490_v15, %v5486_v13 }
 0x14d   :  { %5173 = vmatprep.mubr.bf16.mxu1 %v448_v17 }
 0x14e   :  { %5174 = vmatmul.mubr.bf16.gmra.mxu1 %v449_v16 }
 0x1d6   :  { %v5147_v22 = vpop.f32.mrf.mxu1 }
 0x1d7   :  { %v855_v25 = vadd.f32 %v5147_v22, %v694_v19  ;;  %v742_v22 = vpop.permute.xlu1 %741 }
 0x1d8   :  { %v548_v24 = vpop.f32.mrf.mxu1 }
 0x1d9   :  { %v853_v28 = vadd.f32 %v683_v18, %v548_v24  ;;  %v895_v32 = vsel %vm885_vm0, %v855_v25, -inf }
 0x1da   :  { %v5148_v26 = vpop.f32.mrf.mxu1 }
 0x1db   :  { %v856_v29 = vadd.f32 %v5148_v26, %v698_v21  ;;  %v886_v38 = vsel %vm885_vm0, %v853_v28, -inf }
 0x1dc   :  { %v551_v30 = vpop.f32.mrf.mxu1 }
 0x1dd   :  { %v896_v33 = vsel %vm885_vm0, %v856_v29, -inf  ;;  %v854_v34 = vadd.f32 %v687_v20, %v551_v30 }
 0x1de   :  { %v897_v35 = vmax.f32 %v895_v32, %v896_v33  ;;  %v5151_v36 = vpop.f32.mrf.mxu1 }
 0x1df   :  { %v887_v39 = vsel %vm885_vm0, %v854_v34, -inf  ;;  %v5786_v40 = vadd.f32 %v5151_v36, %v716_v31 }
 0x1e0   :  { %v898_v42 = vrot.slane %v897_v35, 4  ;;  %v888_v43 = vmax.f32 %v886_v38, %v887_v39  ;;  %v564_v44 = vpop.f32.mrf.mxu1 }
 0x1e1   :  { %v913_v49 = vsel %vm885_vm0, %v5786_v40, -inf  ;;  %v5795_v12 = vadd.f32 %v705_v23, %v564_v44 }
 0x1e2   :  { %v899_v46 = vmax.f32 %v897_v35, %v898_v42  ;;  %v889_v47 = vrot.slane %v888_v43, 4  ;;  %v5152_v48 = vpop.f32.mrf.mxu1  ;;  %v753_v42 = vpop.permute.xlu1 %752 }
 0x1e3   :  { %v860_v50 = vadd.f32 %v5152_v48, %v720_v45 }
 0x1e4   :  { %v900_v51 = vrot.slane %v899_v46, 2  ;;  %v890_v52 = vmax.f32 %v888_v43, %v889_v47  ;;  %v567_v53 = vpop.f32.mrf.mxu1 }
 0x1e5   :  { %v914_v54 = vsel %vm885_vm0, %v860_v50, -inf  ;;  %v5797_v13 = vadd.f32 %v709_v27, %v567_v53 }
 0x1e6   :  { %v901_v56 = vmax.f32 %v899_v46, %v900_v51  ;;  %v891_v57 = vrot.slane %v890_v52, 2  ;;  %v915_v58 = vmax.f32 %v913_v49, %v914_v54  ;;  %v5791_v59 = vpop.f32.mrf.mxu1 }
 0x1e7   :  { %v905_v30 = vsel %vm885_vm0, %v5797_v13, -inf }
 0x1e8   :  { %v902_v60 = vrot.slane %v901_v56, 1  ;;  %v892_v61 = vmax.f32 %v890_v52, %v891_v57  ;;  %v916_v62 = vrot.slane %v915_v58, 4  ;;  %v580_v63 = vpop.f32.mrf.mxu1 }
 0x1e9   :  { %v5793_v5 = vadd.f32 %v727_v55, %v580_v63 }
 0x1ea   :  { %v903_v1 = vmax.f32 %v901_v56, %v902_v60  ;;  %v893_v2 = vrot.slane %v892_v61, 1  ;;  %v917_v3 = vmax.f32 %v915_v58, %v916_v62  ;;  %v5156_v4 = vpop.f32.mrf.mxu1  ;;  %v5837_v62 = vadd.f32 %v5791_v59, %v738_v6 }
 0x1eb   :  { %v922_v21 = vsel %vm885_vm0, %v5793_v5, -inf  ;;  %v5839_v63 = vadd.f32 %v5156_v4, %v742_v22 }
 0x1ec   :  { %v1032_v7 = vsub.f32 %v855_v25, %v903_v1  ;;  %v1033_v8 = vsub.f32 %v856_v29, %v903_v1  ;;  %v894_v9 = vmax.f32 %v892_v61, %v893_v2  ;;  %v918_v10 = vrot.slane %v917_v3, 2  ;;  %v583_v11 = vpop.f32.mrf.mxu1  ;;  %v749_v29 = vpop.permute.xlu0 %748 }
 0x1ed   :  { %v5799_v14 = vadd.f32 %v731_v0, %v583_v11 }
 0x1ee   :  { %v1066_v15 = vmul.f32 1.442695, %v1032_v7  ;;  %v1068_v16 = vmul.f32 1.442695, %v1033_v8  ;;  %v1030_v17 = vsub.f32 %v853_v28, %v894_v9  ;;  %v1031_v18 = vsub.f32 %v854_v34, %v894_v9  ;;  %v5801_v19 = vpop.f32.mrf.mxu1 }
 0x1ef   :  { %v919_v20 = vmax.f32 %v917_v3, %v918_v10  ;;  %v923_v23 = vsel %vm885_vm0, %v5799_v14, -inf  ;;  %v904_v28 = vsel %vm885_vm0, %v5795_v12, -inf }
 0x1f0   :  { %5491 = vpow2.f32 %v1066_v15  ;;  %v1062_v24 = vmul.f32 1.442695, %v1030_v17  ;;  %v1064_v25 = vmul.f32 1.442695, %v1031_v18  ;;  %v596_v26 = vpop.f32.mrf.mxu1  ;;  %v924_v34 = vmax.f32 %v922_v21, %v923_v23  ;;  %v5826_v55 = vpop.permute.xlu0 %759 }
 0x1f1   :  { %5493 = vpow2.f32 %v1068_v16  ;;  %v920_v27 = vrot.slane %v919_v20, 1  ;;  %v5811_v31 = vadd.f32 %v749_v29, %v596_v26  ;;  %v906_v39 = vmax.f32 %v904_v28, %v905_v30 }
 0x1f2   :  { %5495 = vpow2.f32 %v1062_v24  ;;  %v5813_v32 = vpop.f32.mrf.mxu1  ;;  %v925_v48 = vrot.slane %v924_v34, 4  ;;  %v931_v15 = vsel %vm885_vm0, %v5837_v62, -inf  ;;  %v932_v16 = vsel %vm885_vm0, %v5839_v63, -inf }
 0x1f3   :  { %5497 = vpow2.f32 %v1064_v25  ;;  %v921_v33 = vmax.f32 %v919_v20, %v920_v27  ;;  %v940_v43 = vsel %vm885_vm0, %v5811_v31, -inf  ;;  %v907_v52 = vrot.slane %v906_v39, 4 }
 0x1f4   :  { %v599_v35 = vpop.f32.mrf.mxu1  ;;  %v771_v18 = vpop.permute.xlu0 %770  ;;  %v933_v29 = vmax.f32 %v931_v15, %v932_v16 }
 0x1f5   :  { %v1036_v36 = vsub.f32 %v5786_v40, %v921_v33  ;;  %v1037_v38 = vsub.f32 %v860_v50, %v921_v33  ;;  %v5818_v44 = vadd.f32 %v753_v42, %v599_v35  ;;  %v926_v40 = vmax.f32 %v924_v34, %v925_v48  ;;  %v5824_v50 = vpop.permute.xlu1 %763 }
 0x1f6   :  { %v5820_v45 = vpop.f32.mrf.mxu1  ;;  %v908_v58 = vmax.f32 %v906_v39, %v907_v52 }
 0x1f7   :  { %v1074_v46 = vmul.f32 1.442695, %v1036_v36  ;;  %v1076_v47 = vmul.f32 1.442695, %v1037_v38  ;;  %v941_v49 = vsel %vm885_vm0, %v5818_v44, -inf  ;;  %v927_v2 = vrot.slane %v926_v40, 2 }
 0x1f8   :  { %v612_v51 = vpop.f32.mrf.mxu1  ;;  %v942_v53 = vmax.f32 %v940_v43, %v941_v49  ;;  %v909_v6 = vrot.slane %v908_v58, 2 }
 0x1f9   :  { %5499 = vpow2.f32 %v1074_v46  ;;  %v775_v17 = vpop.permute.xlu1 %774  ;;  %v928_v20 = vmax.f32 %v926_v40, %v927_v2  ;;  %v5855_v22 = vadd.f32 %v771_v18, %v612_v51  ;;  %v934_v46 = vrot.slane %v933_v29, 4 }
 0x1fa   :  { %5501 = vpow2.f32 %v1076_v47  ;;  %v943_v54 = vrot.slane %v942_v53, 4  ;;  %v5828_v56 = vpop.f32.mrf.mxu1  ;;  %v910_v26 = vmax.f32 %v908_v58, %v909_v6 }
 0x1fb   :  { %v929_v33 = vrot.slane %v928_v20, 1  ;;  %v958_v35 = vsel %vm885_vm0, %v5855_v22, -inf }
 0x1fc   :  { %v944_v3 = vmax.f32 %v942_v53, %v943_v54  ;;  %v615_v10 = vpop.f32.mrf.mxu1  ;;  %v911_v43 = vrot.slane %v910_v26, 1 }
 0x1fd   :  { %v5830_v57 = vpop.eup %5491  ;;  %v5857_v24 = vadd.f32 %v775_v17, %v615_v10  ;;  %v930_v52 = vmax.f32 %v928_v20, %v929_v33 }
 0x1fe   :  { %v5832_v60 = vpop.eup %5493  ;;  %v1135_v61 = vsel %vm885_vm0, %v5830_v57, 0.0  ;;  %v945_v21 = vrot.slane %v944_v3, 2  ;;  %v5859_v28 = vpop.f32.mrf.mxu1  ;;  %v912_v58 = vmax.f32 %v910_v26, %v911_v43 }
 0x1ff   :  { %v5841_v0 = vpop.eup %5495  ;;  %v1136_v1 = vsel %vm885_vm0, %v5832_v60, 0.0  ;;  %v959_v36 = vsel %vm885_vm0, %v5857_v24, -inf  ;;  %v1039_v10 = vsub.f32 %v5799_v14, %v930_v52 }
 0x200   :  { %v5845_v7 = vpop.eup %5497  ;;  %v1137_v8 = vadd.f32 %v1136_v1, %v1135_v61  ;;  %v1126_v9 = vsel %vm885_vm0, %v5841_v0, 0.0  ;;  %v946_v34 = vmax.f32 %v944_v3, %v945_v21  ;;  %v960_v47 = vmax.f32 %v958_v35, %v959_v36  ;;  %v5869_v48 = vpop.f32.mrf.mxu1 }
 0x201   :  { %v1127_v59 = vsel %vm885_vm0, %v5845_v7, 0.0  ;;  %v935_v3 = vmax.f32 %v933_v29, %v934_v46  ;;  %v1035_v16 = vsub.f32 %v5797_v13, %v912_v58  ;;  %v1080_v26 = vmul.f32 1.442695, %v1039_v10 }
 0x202   :  { %v1138_v4 = vrot.slane %v1137_v8, 4  ;;  %v1128_v11 = vadd.f32 %v1127_v59, %v1126_v9  ;;  %v947_v53 = vrot.slane %v946_v34, 1  ;;  %v961_v1 = vrot.slane %v960_v47, 4  ;;  %v5875_v2 = vpop.f32.mrf.mxu1 }
 0x203   :  { %v936_v20 = vrot.slane %v935_v3, 2 }
 0x204   :  { %v1139_v25 = vadd.f32 %v1138_v4, %v1137_v8  ;;  %v1129_v23 = vrot.slane %v1128_v11, 4  ;;  %v1038_v8 = vsub.f32 %v5793_v5, %v930_v52  ;;  %v948_v9 = vmax.f32 %v946_v34, %v947_v53  ;;  %v631_v18 = vpop.f32.mrf.mxu1 }
 0x205   :  { %v962_v59 = vmax.f32 %v960_v47, %v961_v1  ;;  %v937_v13 = vmax.f32 %v935_v3, %v936_v20 }
 0x206   :  { %v1140_v27 = vrot.slane %v1139_v25, 2  ;;  %v5861_v30 = vpop.eup %5499  ;;  %v1130_v42 = vadd.f32 %v1129_v23, %v1128_v11  ;;  %v1034_v11 = vsub.f32 %v5795_v12, %v912_v58  ;;  %v1078_v21 = vmul.f32 1.442695, %v1038_v8  ;;  %v786_v23 = vpop.permute.xlu1 %785 }
 0x207   :  { %v5867_v38 = vpop.eup %5501  ;;  %v1153_v49 = vsel %vm885_vm0, %v5861_v30, 0.0  ;;  %v963_v17 = vrot.slane %v962_v59, 2  ;;  %v1043_v5 = vsub.f32 %v5818_v44, %v948_v9  ;;  %v1072_v12 = vmul.f32 1.442695, %v1035_v16  ;;  %v5883_v36 = vpop.f32.mrf.mxu1 }
 0x208   :  { %v1141_v39 = vadd.f32 %v1140_v27, %v1139_v25  ;;  %v1154_v51 = vsel %vm885_vm0, %v5867_v38, 0.0  ;;  %v1131_v54 = vrot.slane %v1130_v42, 2  ;;  %v1042_v25 = vsub.f32 %v5811_v31, %v948_v9  ;;  %v782_v27 = vpop.permute.xlu0 %781 }
 0x209   :  { %v1155_v61 = vadd.f32 %v1154_v51, %v1153_v49  ;;  %v964_v14 = vmax.f32 %v962_v59, %v963_v17  ;;  %v1070_v33 = vmul.f32 1.442695, %v1034_v11  ;;  %v5891_v44 = vadd.f32 %v5813_v32, %v5824_v50  ;;  %v644_v53 = vpop.f32.mrf.mxu1 }
 0x20a   :  { %v1142_v40 = vrot.slane %v1141_v39, 1  ;;  %v1132_v4 = vadd.f32 %v1131_v54, %v1130_v42  ;;  %v1086_v31 = vmul.f32 1.442695, %v1042_v25  ;;  %v797_v42 = vpop.permute.xlu1 %796  ;;  %v1088_v43 = vmul.f32 1.442695, %v1043_v5 }
 0x20b   :  { %v1156_v15 = vrot.slane %v1155_v61, 4  ;;  %v965_v35 = vrot.slane %v964_v14, 1  ;;  %v950_v32 = vsel %vm885_vm0, %v5891_v44, -inf  ;;  %v5900_v54 = vadd.f32 %v5820_v45, %v782_v27 }
 0x20c   :  { %v1143_v6 = vadd.f32 %v1142_v40, %v1141_v39  ;;  %v1133_v29 = vrot.slane %v1132_v4, 1  ;;  %v5887_v39 = vadd.f32 %v5801_v19, %v5826_v55  ;;  %v793_v47 = vpop.permute.xlu0 %792  ;;  %v938_v40 = vrot.slane %v937_v13, 1 }
 0x20d   :  { %v1157_v34 = vadd.f32 %v1156_v15, %v1155_v61  ;;  %v966_v46 = vmax.f32 %v964_v14, %v965_v35  ;;  %v5903_v58 = vadd.f32 %v5828_v56, %v786_v23  ;;  %v5908_v10 = vadd.f32 %v793_v47, %v5869_v48 }
 0x20e   :  { %5503 = vrcp.f32 %v1143_v6  ;;  %v1134_v49 = vadd.f32 %v1133_v29, %v1132_v4  ;;  %v949_v55 = vsel %vm885_vm0, %v5887_v39, -inf  ;;  %v808_v61 = vpop.permute.xlu1 %807  ;;  %v939_v8 = vmax.f32 %v937_v13, %v938_v40 }
 0x20f   :  { %5505 = vpow2.f32 %v1078_v21  ;;  %v1158_v51 = vrot.slane %v1157_v34, 2  ;;  %v1046_v52 = vsub.f32 %v5855_v22, %v966_v46  ;;  %v1047_v19 = vsub.f32 %v5857_v24, %v966_v46  ;;  %v5905_v24 = vpop.f32.mrf.mxu1 }
 0x210   :  { %5507 = vpow2.f32 %v1080_v26  ;;  %v804_v3 = vpop.permute.xlu0 %803  ;;  %v951_v9 = vmax.f32 %v949_v55, %v950_v32  ;;  %v967_v45 = vsel %vm885_vm0, %v5900_v54, -inf  ;;  %v968_v56 = vsel %vm885_vm0, %v5903_v58, -inf }
 0x211   :  { %5509 = vpow2.f32 %v1070_v33  ;;  %v1094_v50 = vmul.f32 1.442695, %v1046_v52  ;;  %v1096_v22 = vmul.f32 1.442695, %v1047_v19  ;;  %v1159_v1 = vadd.f32 %v1158_v51, %v1157_v34  ;;  %v647_v11 = vpop.f32.mrf.mxu1 }
 0x212   :  { %5511 = vpow2.f32 %v1072_v12  ;;  %v5914_v59 = vadd.f32 %v797_v42, %v631_v18  ;;  %v1040_v15 = vsub.f32 %v5837_v62, %v939_v8  ;;  %v952_v16 = vrot.slane %v951_v9, 4  ;;  %v819_v21 = vpop.permute.xlu1 %818 }
 0x213   :  { %5513 = vpow2.f32 %v1086_v31  ;;  %v1160_v4 = vrot.slane %v1159_v1, 1  ;;  %v969_v20 = vmax.f32 %v967_v45, %v968_v56  ;;  %v976_v48 = vsel %vm885_vm0, %v5908_v10, -inf }
 0x214   :  { %5515 = vpow2.f32 %v1088_v43  ;;  %v815_v25 = vpop.permute.xlu0 %814  ;;  %v977_v18 = vsel %vm885_vm0, %v5914_v59, -inf  ;;  %v5927_v5 = vadd.f32 %v819_v21, %v647_v11  ;;  %v1041_v34 = vsub.f32 %v5839_v63, %v939_v8 }
 0x215   :  { %5517 = vrcp.f32 %v1134_v49  ;;  %v5925_v26 = vadd.f32 %v815_v25, %v644_v53  ;;  %v1161_v14 = vadd.f32 %v1160_v4, %v1159_v1  ;;  %v1082_v12 = vmul.f32 1.442695, %v1040_v15 }
 0x216   :  { %5519 = vpow2.f32 %v1094_v50  ;;  %v953_v35 = vmax.f32 %v951_v9, %v952_v16  ;;  %v978_v42 = vmax.f32 %v976_v48, %v977_v18  ;;  %v970_v63 = vrot.slane %v969_v20, 4 }
 0x217   :  { %5521 = vpow2.f32 %v1096_v22  ;;  %v994_v47 = vsel %vm885_vm0, %v5925_v26, -inf  ;;  %v995_v49 = vsel %vm885_vm0, %v5927_v5, -inf  ;;  %v5959_v53 = vadd.f32 %v5875_v2, %v808_v61 }
 0x218   :  { %5523 = vrcp.f32 %v1161_v14  ;;  %v5962_v40 = vadd.f32 %v5859_v28, %v804_v3  ;;  %v1084_v19 = vmul.f32 1.442695, %v1041_v34  ;;  %v979_v1 = vrot.slane %v978_v42, 4 }
 0x219   :  { %v996_v8 = vmax.f32 %v994_v47, %v995_v49  ;;  %v954_v61 = vrot.slane %v953_v35, 2  ;;  %5525 = vpow2.f32 %v1082_v12  ;;  %v971_v3 = vmax.f32 %v969_v20, %v970_v63 }
 0x21a   :  { %v986_v45 = vsel %vm885_vm0, %v5959_v53, -inf  ;;  %v985_v56 = vsel %vm885_vm0, %v5962_v40, -inf  ;;  %5527 = vpow2.f32 %v1084_v19  ;;  %v980_v16 = vmax.f32 %v978_v42, %v979_v1 }
 0x21b   :  { %v5504_v6 = vpop.eup %5503  ;;  %v997_v20 = vrot.slane %v996_v8, 4  ;;  %v987_v21 = vmax.f32 %v985_v56, %v986_v45  ;;  %v955_v18 = vmax.f32 %v953_v35, %v954_v61  ;;  %v972_v14 = vrot.slane %v971_v3, 2 }
 0x21c   :  { %v5917_v17 = vpop.eup %5505  ;;  %v5930_v62 = vmul.f32 %v5504_v6, %v5830_v57  ;;  %v5935_v29 = vmul.f32 %v5504_v6, %v5832_v60 }
 0x21d   :  { %v5921_v23 = vpop.eup %5507  ;;  %v1162_v31 = vsel %vm885_vm0, %v5917_v17, 0.0  ;;  %v956_v63 = vrot.slane %v955_v18, 1  ;;  %v973_v42 = vmax.f32 %v971_v3, %v972_v14 }
 0x21e   :  { %v5932_v27 = vpop.eup %5509  ;;  %v1163_v57 = vsel %vm885_vm0, %v5921_v23, 0.0  ;;  %v1319_v43 = vpack.c.bf16 %v5935_v29, %v5930_v62 }
 0x21f   :  { %v5937_v33 = vpop.eup %5511  ;;  %v1144_v46 = vsel %vm885_vm0, %v5932_v27, 0.0  ;;  %v1164_v55 = vadd.f32 %v1163_v57, %v1162_v31  ;;  %v981_v31 = vrot.slane %v980_v16, 2  ;;  %v998_v57 = vmax.f32 %v996_v8, %v997_v20 }
 0x220   :  { %v5940_v13 = vpop.eup %5513  ;;  %v1145_v52 = vsel %vm885_vm0, %v5937_v33, 0.0  ;;  %1395 = vxpose.xlu1.c.b16.start.end [1/1] (short) (narrow) %v1319_v43, 16  ;;  %v974_v1 = vrot.slane %v973_v42, 1 }
 0x221   :  { %v5948_v60 = vpop.eup %5515  ;;  %v1180_v50 = vsel %vm885_vm0, %v5940_v13, 0.0  ;;  %v1146_v2 = vadd.f32 %v1145_v52, %v1144_v46  ;;  %v1165_v6 = vrot.slane %v1164_v55, 4  ;;  %v988_v46 = vrot.slane %v987_v21, 4 }
 0x222   :  { %v5518_v51 = vpop.eup %5517  ;;  %v1181_v22 = vsel %vm885_vm0, %v5948_v60, 0.0  ;;  %v982_v35 = vmax.f32 %v980_v16, %v981_v31  ;;  %v999_v19 = vrot.slane %v998_v57, 2  ;;  %v975_v20 = vmax.f32 %v973_v42, %v974_v1 }
 0x223   :  { %v5964_v32 = vpop.eup %5519  ;;  %v5973_v28 = vmul.f32 %v5518_v51, %v5841_v0  ;;  %v1182_v4 = vadd.f32 %v1181_v22, %v1180_v50  ;;  %v5980_v11 = vmul.f32 %v5518_v51, %v5845_v7  ;;  %v1147_v48 = vrot.slane %v1146_v2, 4 }
 0x224   :  { %v5970_v9 = vpop.eup %5521  ;;  %v1198_v15 = vsel %vm885_vm0, %v5964_v32, 0.0  ;;  %v1166_v7 = vadd.f32 %v1165_v6, %v1164_v55  ;;  %v989_v55 = vmax.f32 %v987_v21, %v988_v46  ;;  %v957_v22 = vmax.f32 %v955_v18, %v956_v63 }
 0x225   :  { %v1199_v0 = vsel %vm885_vm0, %v5970_v9, 0.0  ;;  %v1318_v25 = vpack.c.bf16 %v5980_v11, %v5973_v28  ;;  %v1183_v34 = vrot.slane %v1182_v4, 4  ;;  %v1148_v43 = vadd.f32 %v1147_v48, %v1146_v2  ;;  %v5524_v47 = vpop.eup %5523 }
 0x226   :  { %v1200_v12 = vadd.f32 %v1199_v0, %v1198_v15  ;;  %v1167_v52 = vrot.slane %v1166_v7, 2  ;;  %v5992_v8 = vmul.f32 %v5524_v47, %v5861_v30  ;;  %v5994_v2 = vpop.eup %5525  ;;  %v983_v6 = vrot.slane %v982_v35, 1 }
 0x227   :  { %1334 = vxpose.xlu0.c.b16.start.end [1/1] (short) (narrow) %v1318_v25, 16  ;;  %v1184_v49 = vadd.f32 %v1183_v34, %v1182_v4  ;;  %v1149_v50 = vrot.slane %v1148_v43, 2  ;;  %v5997_v45 = vpop.eup %5527  ;;  %v1000_v4 = vmax.f32 %v998_v57, %v999_v19  ;;  %v990_v0 = vrot.slane %v989_v55, 2 }
 0x228   :  { %v1201_v51 = vrot.slane %v1200_v12, 4  ;;  %v1168_v56 = vadd.f32 %v1167_v52, %v1166_v7  ;;  %v1044_v16 = vsub.f32 %v5887_v39, %v957_v22  ;;  %v1045_v30 = vsub.f32 %v5891_v44, %v957_v22  ;;  %v6010_v44 = vpop.f32.mrf.mxu1  ;;  %v5591_v22 = vld [vmem:[#allocation2 + $0x8] sm:$0xff]  }
 0x229   :  { %v1185_v61 = vrot.slane %v1184_v49, 2  ;;  %v1150_v15 = vadd.f32 %v1149_v50, %v1148_v43  ;;  %v6003_v48 = vmul.f32 %v5524_v47, %v5867_v38  ;;  %v1171_v21 = vsel %vm885_vm0, %v5994_v2, 0.0 }
 0x22a   :  { %2327 = vxpose.xlu1.b32.start [1/2] (short) (narrow) %v5973_v28, 16  ;;  %v1202_v3 = vadd.f32 %v1201_v51, %v1200_v12  ;;  %v1172_v25 = vsel %vm885_vm0, %v5997_v45, 0.0  ;;  %v1169_v34 = vrot.slane %v1168_v56, 1  ;;  %v984_v12 = vmax.f32 %v982_v35, %v983_v6 }
 0x22b   :  { %2440 = vxpose.xlu0.b32.start [1/2] (short) (narrow) %v5930_v62, 16  ;;  %v1186_v18 = vadd.f32 %v1185_v61, %v1184_v49  ;;  %v1001_v7 = vrot.slane %v1000_v4, 1  ;;  %v1151_v39 = vrot.slane %v1150_v15, 1  ;;  %v991_v31 = vmax.f32 %v989_v55, %v990_v0  ;;  %v660_v55 = vpop.f32.mrf.mxu1 }
 0x22c   :  { %v1203_v14 = vrot.slane %v1202_v3, 2  ;;  %v1173_v57 = vadd.f32 %v1172_v25, %v1171_v21  ;;  %v1090_v38 = vmul.f32 1.442695, %v1044_v16  ;;  %v1048_v43 = vsub.f32 %v5900_v54, %v975_v20  ;;  %v5592_v54 = vld [vmem:[#allocation2] sm:$0xff]   ;;  %v826_v21 = vpop.permute.xlu0 %825 }
 0x22d   :  { %v1092_v46 = vmul.f32 1.442695, %v1045_v30  ;;  %v1187_v63 = vrot.slane %v1186_v18, 1  ;;  %v1170_v47 = vadd.f32 %v1169_v34, %v1168_v56  ;;  %v1050_v49 = vsub.f32 %v5908_v10, %v984_v12  ;;  %v5176_v16 = vpop.f32.mrf.mxu1 }
 0x22e   :  { %2328 = vxpose.xlu1.b32.end [2/2] (short) (narrow) %v5980_v11, 16  ;;  %v1204_v42 = vadd.f32 %v1203_v14, %v1202_v3  ;;  %v1002_v51 = vmax.f32 %v1000_v4, %v1001_v7  ;;  %v5679_v52 = vmov 0.0   ;;  %v1152_v35 = vadd.f32 %v1151_v39, %v1150_v15 }
 0x22f   :  { %2441 = vxpose.xlu0.b32.end [2/2] (short) (narrow) %v5935_v29, 16  ;;  %5183 = vmatprep.subr.bf16.mxu1 %v5679_v52  ;;  %v992_v19 = vrot.slane %v991_v31, 1  ;;  %v1051_v50 = vsub.f32 %v5914_v59, %v984_v12  ;;  %v1174_v1 = vrot.slane %v1173_v57, 4  ;;  %5529 = vpow2.f32 %v1090_v38 }
 0x230   :  { %5177 = vmatprep.subr.bf16.mxu0 %v5679_v52  ;;  %5184 = vmatpush3.bf16.msra.mxu1 %v5591_v22  ;;  %v1049_v61 = vsub.f32 %v5903_v58, %v975_v20  ;;  %v1098_v10 = vmul.f32 1.442695, %v1048_v43  ;;  %5531 = vpow2.f32 %v1092_v46  ;;  %v1188_v3 = vadd.f32 %v1187_v63, %v1186_v18  ;;  %v830_v20 = vpop.permute.xlu1 %829  ;;  %v837_v39 = vpop.permute.xlu0 %836 }
 0x231   :  { %5178 = vmatpush3.bf16.msra.mxu0 %v5592_v54  ;;  %5195 = vmatprep.subr.bf16.mxu1 %v5679_v52  ;;  %v1205_v56 = vrot.slane %v1204_v42, 1  ;;  %5533 = vrcp.f32 %v1170_v47  ;;  %v1102_v6 = vmul.f32 1.442695, %v1050_v49  ;;  %v1054_v59 = vsub.f32 %v5925_v26, %v1002_v51  ;;  %v663_v26 = vpop.f32.mrf.mxu1 }
 0x232   :  { %2666 = vxpose.xlu1.b32.start [1/2] (short) (narrow) %v5992_v8, 16  ;;  %5189 = vmatprep.subr.bf16.mxu0 %v5679_v52  ;;  %5535 = vrcp.f32 %v1152_v35  ;;  %v993_v4 = vmax.f32 %v991_v31, %v992_v19  ;;  %v1104_v15 = vmul.f32 1.442695, %v1051_v50  ;;  %v1055_v0 = vsub.f32 %v5927_v5, %v1002_v51 }
 0x233   :  { %v1175_v30 = vadd.f32 %v1174_v1, %v1173_v57  ;;  %5537 = vpow2.f32 %v1098_v10  ;;  %v1100_v58 = vmul.f32 1.442695, %v1049_v61  ;;  %v1206_v25 = vadd.f32 %v1205_v56, %v1204_v42  ;;  %5179 = vmatprep.mubr.msk.bf16.mxu0 %vm5680_vm1, %v5679_v52  ;;  %5185 = vmatprep.mubr.msk.bf16.mxu1 %vm5680_vm1, %v5679_v52 }
 0x234   :  { %5539 = vrcp.f32 %v1188_v3  ;;  %v1110_v18 = vmul.f32 1.442695, %v1054_v59  ;;  %v1052_v14 = vsub.f32 %v5962_v40, %v993_v4  ;;  %v1112_v34 = vmul.f32 1.442695, %v1055_v0  ;;  %v841_v5 = vpop.permute.xlu1 %840  ;;  %v848_v51 = vpop.permute.xlu0 %847 }
 0x235   :  { %5541 = vpow2.f32 %v1102_v6  ;;  %v1176_v12 = vrot.slane %v1175_v30, 2  ;;  %v1053_v7 = vsub.f32 %v5959_v53, %v993_v4  ;;  %v6024_v31 = vadd.f32 %v837_v39, %v660_v55 }
 0x236   :  { %2667 = vxpose.xlu1.b32.end [2/2] (short) (narrow) %v6003_v48, 16  ;;  %5543 = vpow2.f32 %v1104_v15  ;;  %v6026_v57 = vadd.f32 %v841_v5, %v663_v26  ;;  %v1106_v40 = vmul.f32 1.442695, %v1052_v14  ;;  %v6037_v63 = vadd.f32 %v5905_v24, %v830_v20 }
 0x237   :  { %5545 = vpow2.f32 %v1100_v58  ;;  %v1177_v38 = vadd.f32 %v1176_v12, %v1175_v30  ;;  %v1108_v43 = vmul.f32 1.442695, %v1053_v7  ;;  %v6040_v42 = vadd.f32 %v5883_v36, %v826_v21 }
 0x238   :  { %5547 = vrcp.f32 %v1206_v25  ;;  %v1012_v47 = vsel %vm885_vm0, %v6024_v31, -inf  ;;  %v852_v49 = vpop.permute.xlu1 %851  ;;  %v1013_v35 = vsel %vm885_vm0, %v6026_v57, -inf  ;;  %v6051_v36 = vadd.f32 %v6010_v44, %v848_v51 }
 0x239   :  { %5549 = vpow2.f32 %v1110_v18  ;;  %v1178_v55 = vrot.slane %v1177_v38, 1  ;;  %v6048_v24 = vadd.f32 %v5176_v16, %v852_v49  ;;  %v1014_v54 = vmax.f32 %v1012_v47, %v1013_v35 }
 0x23a   :  { %5551 = vpow2.f32 %v1112_v34  ;;  %v1004_v61 = vsel %vm885_vm0, %v6037_v63, -inf  ;;  %v1003_v10 = vsel %vm885_vm0, %v6040_v42, -inf  ;;  %v1321_v20 = vpack.c.bf16 %v6003_v48, %v5992_v8 }
 0x23b   :  { %5553 = vpow2.f32 %v1106_v40  ;;  %v1179_v44 = vadd.f32 %v1178_v55, %v1177_v38  ;;  %v1005_v16 = vmax.f32 %v1003_v10, %v1004_v61  ;;  %v1015_v30 = vrot.slane %v1014_v54, 4 }
 0x23c   :  { %v6032_v53 = vpop.eup %5529  ;;  %5555 = vpow2.f32 %v1108_v43 }
 0x23d   :  { %v6034_v46 = vpop.eup %5531  ;;  %v1189_v4 = vsel %vm885_vm0, %v6032_v53, 0.0  ;;  %5557 = vrcp.f32 %v1179_v44  ;;  %v1016_v38 = vmax.f32 %v1014_v54, %v1015_v30  ;;  %v1006_v49 = vrot.slane %v1005_v16, 4 }
 0x23e   :  { %v5534_v19 = vpop.eup %5533  ;;  %v1190_v15 = vsel %vm885_vm0, %v6034_v46, 0.0 }
 0x23f   :  { %v5536_v50 = vpop.eup %5535  ;;  %v6058_v3 = vmul.f32 %v5534_v19, %v5917_v17  ;;  %v6061_v56 = vmul.f32 %v5534_v19, %v5921_v23  ;;  %v1022_v17 = vsel %vm885_vm0, %v6048_v24, -inf  ;;  %v1021_v23 = vsel %vm885_vm0, %v6051_v36, -inf }
 0x240   :  { %v6046_v22 = vpop.eup %5537  ;;  %v6094_v12 = vmul.f32 %v5536_v50, %v5932_v27  ;;  %v6097_v7 = vmul.f32 %v5536_v50, %v5937_v33  ;;  %v1023_v40 = vmax.f32 %v1021_v23, %v1022_v17 }
 0x241   :  { %v5540_v1 = vpop.eup %5539  ;;  %v1322_v21 = vpack.c.bf16 %v6061_v56, %v6058_v3 }
 0x242   :  { %v6063_v6 = vpop.eup %5541  ;;  %v6082_v25 = vmul.f32 %v5540_v1, %v5940_v13  ;;  %v6085_v18 = vmul.f32 %v5540_v1, %v5948_v60  ;;  %v1191_v13 = vadd.f32 %v1190_v15, %v1189_v4  ;;  %v1207_v60 = vsel %vm885_vm0, %v6046_v22, 0.0 }
 0x243   :  { %v6065_v59 = vpop.eup %5543  ;;  %v1216_v34 = vsel %vm885_vm0, %v6063_v6, 0.0  ;;  %v1320_v19 = vpack.c.bf16 %v6097_v7, %v6094_v12  ;;  %v1017_v1 = vrot.slane %v1016_v38, 2  ;;  %v1024_v10 = vrot.slane %v1023_v40, 4 }
 0x244   :  { %v6071_v0 = vpop.eup %5545  ;;  %v1217_v26 = vsel %vm885_vm0, %v6065_v59, 0.0  ;;  %v1324_v27 = vpack.c.bf16 %v6085_v18, %v6082_v25  ;;  %v1192_v55 = vrot.slane %v1191_v13, 4  ;;  %v1007_v4 = vmax.f32 %v1005_v16, %v1006_v49 }
 0x245   :  { %v5548_v58 = vpop.eup %5547  ;;  %v1208_v39 = vsel %vm885_vm0, %v6071_v0, 0.0  ;;  %v1218_v43 = vadd.f32 %v1217_v26, %v1216_v34  ;;  %v1025_v34 = vmax.f32 %v1023_v40, %v1024_v10 }
 0x246   :  { %v6087_v14 = vpop.eup %5549  ;;  %v6108_v33 = vmul.f32 %v5548_v58, %v5964_v32  ;;  %v6111_v47 = vmul.f32 %v5548_v58, %v5970_v9  ;;  %v1209_v32 = vadd.f32 %v1208_v39, %v1207_v60  ;;  %v1193_v15 = vadd.f32 %v1192_v55, %v1191_v13 }
 0x247   :  { %v6099_v5 = vpop.eup %5551  ;;  %v1234_v51 = vsel %vm885_vm0, %v6087_v14, 0.0  ;;  %v1219_v9 = vrot.slane %v1218_v43, 4  ;;  %v1018_v58 = vmax.f32 %v1016_v38, %v1017_v1  ;;  %v1008_v60 = vrot.slane %v1007_v4, 2 }
 0x248   :  { %v1235_v35 = vsel %vm885_vm0, %v6099_v5, 0.0  ;;  %v6119_v50 = vpop.eup %5553  ;;  %v1326_v44 = vpack.c.bf16 %v6111_v47, %v6108_v33  ;;  %v1210_v30 = vrot.slane %v1209_v32, 4  ;;  %v1194_v39 = vrot.slane %v1193_v15, 2 }
 0x249   :  { %v6121_v54 = vpop.eup %5555  ;;  %v1236_v61 = vadd.f32 %v1235_v35, %v1234_v51  ;;  %v1225_v17 = vsel %vm885_vm0, %v6119_v50, 0.0  ;;  %v1019_v13 = vrot.slane %v1018_v58, 1  ;;  %v1026_v35 = vrot.slane %v1025_v34, 2 }
 0x24a   :  { %v1226_v23 = vsel %vm885_vm0, %v6121_v54, 0.0  ;;  %v1211_v16 = vadd.f32 %v1210_v30, %v1209_v32  ;;  %v1009_v55 = vmax.f32 %v1007_v4, %v1008_v60 }
 0x24b   :  { %v1227_v26 = vadd.f32 %v1226_v23, %v1225_v17  ;;  %v1020_v1 = vmax.f32 %v1018_v58, %v1019_v13  ;;  %v1027_v10 = vmax.f32 %v1025_v34, %v1026_v35 }
 0x24c   :  { %v1010_v17 = vrot.slane %v1009_v55, 1 }
 0x24d   :  { %v1058_v4 = vsub.f32 %v6024_v31, %v1020_v1  ;;  %v1059_v34 = vsub.f32 %v6026_v57, %v1020_v1 }
 0x253   :  { %1515 = vxpose.xlu0.c.b16.start.end [1/1] (short) (narrow) %v1321_v20, 16  ;;  %v1220_v20 = vadd.f32 %v1219_v9, %v1218_v43  ;;  %v1212_v43 = vrot.slane %v1211_v16, 2 }
 0x254   :  { %1575 = vxpose.xlu1.c.b16.start.end [1/1] (short) (narrow) %v1322_v21, 16  ;;  %v1237_v21 = vrot.slane %v1236_v61, 4 }
 0x255   :  { %v1221_v49 = vrot.slane %v1220_v20, 2 }
 0x256   :  { %v1238_v51 = vadd.f32 %v1237_v21, %v1236_v61  ;;  %v1213_v61 = vadd.f32 %v1212_v43, %v1211_v16  ;;  %v1120_v16 = vmul.f32 1.442695, %v1059_v34 }
 0x257   :  { %1455 = vxpose.xlu0.c.b16.start.end [1/1] (short) (narrow) %v1320_v19, 16  ;;  %v1228_v19 = vrot.slane %v1227_v26, 4  ;;  %v1222_v40 = vadd.f32 %v1221_v49, %v1220_v20  ;;  %v1011_v20 = vmax.f32 %v1009_v55, %v1010_v17 }
 0x258   :  { %1695 = vxpose.xlu1.c.b16.start.end [1/1] (short) (narrow) %v1324_v27, 16  ;;  %v5558_v27 = vpop.eup %5557  ;;  %v1239_v9 = vrot.slane %v1238_v51, 2 }
 0x259   :  { %v6132_v38 = vmul.f32 %v5558_v27, %v5994_v2  ;;  %v1229_v32 = vadd.f32 %v1228_v19, %v1227_v26  ;;  %v6136_v30 = vmul.f32 %v5558_v27, %v5997_v45  ;;  %v1028_v2 = vrot.slane %v1027_v10, 1 }
 0x25a   :  { %v1240_v21 = vadd.f32 %v1239_v9, %v1238_v51  ;;  %v1118_v26 = vmul.f32 1.442695, %v1058_v4  ;;  %v1056_v27 = vsub.f32 %v6040_v42, %v1011_v20  ;;  %v1057_v31 = vsub.f32 %v6037_v63, %v1011_v20 }
 0x25b   :  { %2553 = vxpose.xlu0.b32.start [1/2] (short) (narrow) %v6094_v12, 16  ;;  %v1230_v58 = vrot.slane %v1229_v32, 2  ;;  %v1029_v35 = vmax.f32 %v1027_v10, %v1028_v2 }
 0x25c   :  { %1815 = vxpose.xlu1.c.b16.start.end [1/1] (short) (narrow) %v1326_v44, 16  ;;  %v1195_v44 = vadd.f32 %v1194_v39, %v1193_v15  ;;  %v1223_v15 = vrot.slane %v1222_v40, 1  ;;  %v1214_v39 = vrot.slane %v1213_v61, 1  ;;  %v1241_v49 = vrot.slane %v1240_v21, 1 }
 0x25d   :  { %v1231_v45 = vadd.f32 %v1230_v58, %v1229_v32  ;;  %v1060_v55 = vsub.f32 %v6051_v36, %v1029_v35  ;;  %v1116_v43 = vmul.f32 1.442695, %v1057_v31  ;;  %v1061_v1 = vsub.f32 %v6048_v24, %v1029_v35 }
 0x25e   :  { %v1196_v23 = vrot.slane %v1195_v44, 1  ;;  %v1224_v13 = vadd.f32 %v1223_v15, %v1222_v40  ;;  %v1215_v51 = vadd.f32 %v1214_v39, %v1213_v61  ;;  %v1242_v19 = vadd.f32 %v1241_v49, %v1240_v21 }
 0x25f   :  { %2554 = vxpose.xlu0.b32.end [2/2] (short) (narrow) %v6097_v7, 16  ;;  %v1232_v57 = vrot.slane %v1231_v45, 1  ;;  %v1122_v40 = vmul.f32 1.442695, %v1060_v55  ;;  %v1124_v9 = vmul.f32 1.442695, %v1061_v1  ;;  %v1323_v58 = vpack.c.bf16 %v6136_v30, %v6132_v38 }
 0x260   :  { %v1197_v60 = vadd.f32 %v1196_v23, %v1195_v44  ;;  %v1114_v44 = vmul.f32 1.442695, %v1056_v27 }
 0x261   :  { %v1233_v42 = vadd.f32 %v1232_v57, %v1231_v45 }
 0x262   :  { %5559 = vrcp.f32 %v1197_v60 }
 0x263   :  { %5561 = vpow2.f32 %v1118_v26 }
 0x264   :  { %5563 = vrcp.f32 %v1224_v13 }
 0x265   :  { %5565 = vpow2.f32 %v1120_v16 }
 0x266   :  { %2892 = vxpose.xlu1.b32.start [1/2] (short) (narrow) %v6132_v38, 16  ;;  %5567 = vrcp.f32 %v1215_v51 }
 0x267   :  { %5569 = vrcp.f32 %v1242_v19 }
 0x268   :  { %5571 = vpow2.f32 %v1114_v44 }
 0x269   :  { %5573 = vpow2.f32 %v1116_v43  ;;  %v5594_v43 = vld [vmem:[#allocation2 + $0x10] sm:$0xff]  }
 0x26a   :  { %2893 = vxpose.xlu1.b32.end [2/2] (short) (narrow) %v6136_v30, 16  ;;  %5575 = vpow2.f32 %v1122_v40 }
 0x26b   :  { %5577 = vrcp.f32 %v1233_v42 }
 0x26c   :  { %5579 = vpow2.f32 %v1124_v9 }
 0x26f   :  { %v5560_v63 = vpop.eup %5559 }
 0x270   :  { %v6145_v10 = vpop.eup %5561  ;;  %v6150_v23 = vmul.f32 %v5560_v63, %v6032_v53  ;;  %v6165_v53 = vmul.f32 %v5560_v63, %v6034_v46 }
 0x271   :  { %v5564_v36 = vpop.eup %5563  ;;  %v1252_v21 = vsel %vm885_vm0, %v6145_v10, 0.0 }
 0x272   :  { %v6147_v32 = vpop.eup %5565  ;;  %v6153_v24 = vmul.f32 %v5564_v36, %v6063_v6  ;;  %v6156_v61 = vmul.f32 %v5564_v36, %v6065_v59  ;;  %v5593_v59 = vld [vmem:[#allocation2 + $0x18] sm:$0xff]   ;;  %v1325_v13 = vpack.c.bf16 %v6165_v53, %v6150_v23 }
 0x273   :  { %v5568_v17 = vpop.eup %5567  ;;  %v1253_v2 = vsel %vm885_vm0, %v6147_v32, 0.0 }
 0x274   :  { %v5570_v15 = vpop.eup %5569  ;;  %v1254_v34 = vadd.f32 %v1253_v2, %v1252_v21  ;;  %v1328_v60 = vpack.c.bf16 %v6156_v61, %v6153_v24  ;;  %v6188_v49 = vmul.f32 %v5568_v17, %v6046_v22  ;;  %v6191_v35 = vmul.f32 %v5568_v17, %v6071_v0 }
 0x275   :  { %v6168_v6 = vpop.eup %5571  ;;  %v6178_v46 = vmul.f32 %v5570_v15, %v6087_v14  ;;  %v6181_v39 = vmul.f32 %v5570_v15, %v6099_v5 }
 0x276   :  { %v6172_v20 = vpop.eup %5573  ;;  %v1243_v27 = vsel %vm885_vm0, %v6168_v6, 0.0  ;;  %v1255_v16 = vrot.slane %v1254_v34, 4  ;;  %v1327_v0 = vpack.c.bf16 %v6191_v35, %v6188_v49 }
 0x277   :  { %v6183_v26 = vpop.eup %5575  ;;  %v1244_v14 = vsel %vm885_vm0, %v6172_v20, 0.0  ;;  %v1330_v31 = vpack.c.bf16 %v6181_v39, %v6178_v46 }
 0x278   :  { %v5578_v45 = vpop.eup %5577  ;;  %v1245_v22 = vadd.f32 %v1244_v14, %v1243_v27  ;;  %v1261_v57 = vsel %vm885_vm0, %v6183_v26, 0.0  ;;  %v1256_v1 = vadd.f32 %v1255_v16, %v1254_v34 }
 0x279   :  { %v6197_v5 = vpop.eup %5579  ;;  %v6204_v51 = vmul.f32 %v5578_v45, %v6119_v50  ;;  %v6207_v19 = vmul.f32 %v5578_v45, %v6121_v54 }
 0x27a   :  { %v1262_v44 = vsel %vm885_vm0, %v6197_v5, 0.0  ;;  %v1246_v50 = vrot.slane %v1245_v22, 4  ;;  %v1257_v42 = vrot.slane %v1256_v1, 2 }
 0x27b   :  { %v1263_v54 = vadd.f32 %v1262_v44, %v1261_v57  ;;  %v1329_v40 = vpack.c.bf16 %v6207_v19, %v6204_v51 }
 0x27c   :  { %v1247_v9 = vadd.f32 %v1246_v50, %v1245_v22  ;;  %v1258_v36 = vadd.f32 %v1257_v42, %v1256_v1 }
 0x27d   :  { %v1264_v63 = vrot.slane %v1263_v54, 4 }
 0x27e   :  { %v1248_v17 = vrot.slane %v1247_v9, 2  ;;  %v1259_v15 = vrot.slane %v1258_v36, 1 }
 0x280   :  { %v1249_v21 = vadd.f32 %v1248_v17, %v1247_v9 }
 0x282   :  { %v1403_v4 = vpop.trf.xlu1 }
 0x283   :  { %5186 = vmatmul.mubr.msk.bf16.vlgmr.msra.gmra.mxu1 %vm1350_vm2, %v1403_v4  ;;  %1635 = vxpose.xlu0.c.b16.start.end [1/1] (short) (narrow) %v1323_v58, 16  ;;  %v1265_v4 = vadd.f32 %v1264_v63, %v1263_v54  ;;  %v1260_v58 = vadd.f32 %v1259_v15, %v1258_v36  ;;  %v5596_v63 = vld [vmem:[#allocation2 + $0x20] sm:$0xff]  }
 0x284   :  { %5196 = vmatpush3.bf16.msra.mxu1 %v5593_v59  ;;  %5197 = vmatprep.mubr.msk.bf16.mxu1 %vm5680_vm1, %v5679_v52  ;;  %v1250_v59 = vrot.slane %v1249_v21, 1 }
 0x285   :  { %5207 = vmatprep.subr.bf16.mxu1 %v5679_v52  ;;  %v1266_v2 = vrot.slane %v1265_v4, 2  ;;  %5581 = vrcp.f32 %v1260_v58 }
 0x287   :  { %1755 = vxpose.xlu0.c.b16.start.end [1/1] (short) (narrow) %v1325_v13, 16  ;;  %v1267_v34 = vadd.f32 %v1266_v2, %v1265_v4  ;;  %v5598_v4 = vld [vmem:[#allocation2 + $0x40] sm:$0xff]  }
 0x288   :  { %1935 = vxpose.xlu1.c.b16.start.end [1/1] (short) (narrow) %v1328_v60, 16  ;;  %v1251_v60 = vadd.f32 %v1250_v59, %v1249_v21  ;;  %v5599_v21 = vld [vmem:[#allocation2 + $0x50] sm:$0xff]  }
 0x289   :  { %v1342_v55 = vpop.trf.xlu0  ;;  %v1268_v13 = vrot.slane %v1267_v34, 1 }
 0x28a   :  { %5180 = vmatmul.mubr.msk.bf16.vlgmr.msra.gmra.mxu0 %vm1350_vm2, %v1342_v55  ;;  %5583 = vrcp.f32 %v1251_v60 }
 0x28b   :  { %1875 = vxpose.xlu0.c.b16.start.end [1/1] (short) (narrow) %v1327_v0, 16  ;;  %5190 = vmatpush3.bf16.msra.mxu0 %v5594_v43  ;;  %v1269_v45 = vadd.f32 %v1268_v13, %v1267_v34  ;;  %v5600_v13 = vld [vmem:[#allocation2 + $0x38] sm:$0xff]  }
 0x28c   :  { %2055 = vxpose.xlu1.c.b16.start.end [1/1] (short) (narrow) %v1330_v31, 16  ;;  %5191 = vmatprep.mubr.msk.bf16.mxu0 %vm5680_vm1, %v5679_v52 }
 0x28d   :  { %5201 = vmatprep.subr.bf16.mxu0 %v5679_v52  ;;  %5585 = vrcp.f32 %v1269_v45 }
 0x28f   :  { %1995 = vxpose.xlu0.c.b16.start.end [1/1] (short) (narrow) %v1329_v40, 16 }
 0x292   :  { %v5582_v16 = vpop.eup %5581 }
 0x293   :  { %2779 = vxpose.xlu0.b32.start [1/2] (short) (narrow) %v6058_v3, 16  ;;  %v6232_v0 = vmul.f32 %v5582_v16, %v6145_v10  ;;  %v6235_v55 = vmul.f32 %v5582_v16, %v6147_v32  ;;  %v5595_v10 = vld [vmem:[#allocation2 + $0x28] sm:$0xff]   ;;  %v5601_v16 = vld [vmem:[#allocation2 + $0x60] sm:$0xff]  }
 0x295   :  { %v1332_v43 = vpack.c.bf16 %v6235_v55, %v6232_v0 }
 0x296   :  { %3118 = vxpose.xlu1.b32.start [1/2] (short) (narrow) %v6150_v23, 16 }
 0x297   :  { %2780 = vxpose.xlu0.b32.end [2/2] (short) (narrow) %v6061_v56, 16  ;;  %v5584_v57 = vpop.eup %5583 }
 0x298   :  { %v6242_v1 = vmul.f32 %v5584_v57, %v6168_v6  ;;  %v6245_v50 = vmul.f32 %v5584_v57, %v6172_v20 }
 0x29a   :  { %3119 = vxpose.xlu1.b32.end [2/2] (short) (narrow) %v6165_v53, 16  ;;  %v5586_v40 = vpop.eup %5585  ;;  %v1331_v32 = vpack.c.bf16 %v6245_v50, %v6242_v1 }
 0x29b   :  { %v6254_v6 = vmul.f32 %v5586_v40, %v6183_v26  ;;  %v6257_v20 = vmul.f32 %v5586_v40, %v6197_v5  ;;  %v5597_v5 = vld [vmem:[#allocation2 + $0x30] sm:$0xff]  }
 0x29c   :  { %v5603_v40 = vld [vmem:[#allocation2 + $0x70] sm:$0xff]  }
 0x29d   :  { %v1333_v26 = vpack.c.bf16 %v6257_v20, %v6254_v6 }
 0x2a6   :  { %v6223_v27 = vpop.trf.xlu1 }
 0x2a7   :  { %v6225_v14 = vpop.trf.xlu0 }
 0x2aa   :  { %v6227_v31 = vpop.trf.xlu1 }
 0x2ab   :  { %v6229_v22 = vpop.trf.xlu0 }
 0x2ae   :  { %v6237_v44 = vpop.trf.xlu1 }
 0x2b2   :  { %v6259_v9 = vpop.trf.xlu1 }
 0x2b5   :  { %v1523_v54 = vpop.trf.xlu0 }
 0x2b6   :  { %5198 = vmatmul.mubr.msk.bf16.vlgmr.msra.gmra.mxu1 %vm1350_vm2, %v1523_v54  ;;  %v1583_v36 = vpop.trf.xlu1  ;;  %v5602_v54 = vld [vmem:[#allocation2 + $0x48] sm:$0xff]  }
 0x2b7   :  { %5208 = vmatpush3.bf16.msra.mxu1 %v5595_v10  ;;  %5209 = vmatprep.mubr.msk.bf16.mxu1 %vm5680_vm1, %v5679_v52 }
 0x2b8   :  { %2175 = vxpose.xlu1.c.b16.start.end [1/1] (short) (narrow) %v1332_v43, 16  ;;  %5219 = vmatprep.subr.bf16.mxu1 %v5679_v52 }
 0x2b9   :  { %v1463_v42 = vpop.trf.xlu0 }
 0x2ba   :  { %5192 = vmatmul.mubr.msk.bf16.vlgmr.msra.gmra.mxu0 %vm1350_vm2, %v1463_v42  ;;  %v1703_v17 = vpop.trf.xlu1 }
 0x2bb   :  { %2115 = vxpose.xlu0.c.b16.start.end [1/1] (short) (narrow) %v1331_v32, 16  ;;  %5202 = vmatpush3.bf16.msra.mxu0 %v5596_v63  ;;  %v5604_v32 = vld [vmem:[#allocation2 + $0x58] sm:$0xff]   ;;  %v4474_v63 = vmul.f32 %v5980_v11, %v5980_v11 }
 0x2bc   :  { %5203 = vmatprep.mubr.msk.bf16.mxu0 %vm5680_vm1, %v5679_v52  ;;  %5213 = vmatprep.subr.bf16.mxu0 %v5679_v52 }
 0x2be   :  { %v1823_v15 = vpop.trf.xlu1 }
 0x2bf   :  { %2235 = vxpose.xlu0.c.b16.start.end [1/1] (short) (narrow) %v1333_v26, 16  ;;  %v5605_v26 = vld [vmem:[#allocation2 + $0x68] sm:$0xff]  }
 0x2c2   :  { %3344 = vxpose.xlu1.b32.start [1/2] (short) (narrow) %v6188_v49, 16  ;;  %5204 = vmatmul.mubr.msk.bf16.vlgmr.msra.gmra.mxu0 %vm1350_vm2, %v1583_v36  ;;  %v4508_v36 = vsel %vm885_vm0, %v4474_v63, 0.0  ;;  %v4479_v63 = vmul.f32 %v5992_v8, %v5992_v8 }
 0x2c3   :  { %3005 = vxpose.xlu0.b32.start [1/2] (short) (narrow) %v6082_v25, 16  ;;  %5214 = vmatpush3.bf16.msra.mxu0 %v5597_v5  ;;  %v4475_v5 = vmul.f32 %v5930_v62, %v5930_v62 }
 0x2c4   :  { %5215 = vmatprep.mubr.msk.bf16.mxu0 %vm5680_vm1, %v5679_v52  ;;  %5225 = vmatprep.subr.bf16.mxu0 %v5679_v52 }
 0x2c6   :  { %3345 = vxpose.xlu1.b32.end [2/2] (short) (narrow) %v6191_v35, 16 }
 0x2c7   :  { %3006 = vxpose.xlu0.b32.end [2/2] (short) (narrow) %v6085_v18, 16 }
 0x2ca   :  { %3570 = vxpose.xlu1.b32.start [1/2] (short) (narrow) %v6204_v51, 16  ;;  %5216 = vmatmul.mubr.msk.bf16.vlgmr.msra.gmra.mxu0 %vm1350_vm2, %v1703_v17  ;;  %v4511_v17 = vsel %vm885_vm0, %v4475_v5, 0.0  ;;  %v4490_v5 = vmul.f32 %v6111_v47, %v6111_v47 }
 0x2cb   :  { %3231 = vxpose.xlu0.b32.start [1/2] (short) (narrow) %v6108_v33, 16  ;;  %5226 = vmatpush3.bf16.msra.mxu0 %v5598_v4  ;;  %v4489_v4 = vmul.f32 %v6108_v33, %v6108_v33 }
 0x2cc   :  { %5227 = vmatprep.mubr.msk.bf16.mxu0 %vm5680_vm1, %v5679_v52  ;;  %5237 = vmatprep.subr.bf16.mxu0 %v5679_v52 }
 0x2ce   :  { %3571 = vxpose.xlu1.b32.end [2/2] (short) (narrow) %v6207_v19, 16 }
 0x2cf   :  { %3232 = vxpose.xlu0.b32.end [2/2] (short) (narrow) %v6111_v47, 16 }
 0x2d2   :  { %3796 = vxpose.xlu1.b32.start [1/2] (short) (narrow) %v6242_v1, 16  ;;  %5228 = vmatmul.mubr.msk.bf16.vlgmr.msra.gmra.mxu0 %vm1350_vm2, %v1823_v15  ;;  %v4553_v15 = vsel %vm885_vm0, %v4489_v4, 0.0  ;;  %v4523_v4 = vsel %vm885_vm0, %v4479_v63, 0.0 }
 0x2d3   :  { %3457 = vxpose.xlu0.b32.start [1/2] (short) (narrow) %v6153_v24, 16  ;;  %5238 = vmatpush3.bf16.msra.mxu0 %v5599_v21  ;;  %v4491_v21 = vmul.f32 %v6188_v49, %v6188_v49 }
 0x2d4   :  { %5239 = vmatprep.mubr.msk.bf16.mxu0 %vm5680_vm1, %v5679_v52  ;;  %5249 = vmatprep.subr.bf16.mxu0 %v5679_v52 }
 0x2d6   :  { %3797 = vxpose.xlu1.b32.end [2/2] (short) (narrow) %v6245_v50, 16 }
 0x2d7   :  { %3458 = vxpose.xlu0.b32.end [2/2] (short) (narrow) %v6156_v61, 16  ;;  %v6292_v2 = vpop.trf.xlu0 }
 0x2da   :  { %4022 = vxpose.xlu1.b32.start [1/2] (short) (narrow) %v6254_v6, 16 }
 0x2db   :  { %3683 = vxpose.xlu0.b32.start [1/2] (short) (narrow) %v6178_v46, 16  ;;  %v6297_v58 = vpop.trf.xlu0 }
 0x2de   :  { %4023 = vxpose.xlu1.b32.end [2/2] (short) (narrow) %v6257_v20, 16 }
 0x2df   :  { %3684 = vxpose.xlu0.b32.end [2/2] (short) (narrow) %v6181_v39, 16 }
 0x2e2   :  { %v6299_v59 = vpop.trf.xlu1 }
 0x2e3   :  { %3909 = vxpose.xlu0.b32.start [1/2] (short) (narrow) %v6232_v0, 16 }
 0x2e5   :  { %v1643_v60 = vpop.trf.xlu0 }
 0x2e6   :  { %v6302_v34 = vpop.trf.xlu1  ;;  %5210 = vmatmul.mubr.msk.bf16.vlgmr.msra.gmra.mxu1 %vm1350_vm2, %v1643_v60  ;;  %v4559_v60 = vsel %vm885_vm0, %v4491_v21, 0.0  ;;  %v4492_v21 = vmul.f32 %v6191_v35, %v6191_v35 }
 0x2e7   :  { %3910 = vxpose.xlu0.b32.end [2/2] (short) (narrow) %v6235_v55, 16  ;;  %5220 = vmatpush3.bf16.msra.mxu1 %v5600_v13  ;;  %v4477_v13 = vmul.f32 %v6094_v12, %v6094_v12 }
 0x2e8   :  { %5221 = vmatprep.mubr.msk.bf16.mxu1 %vm5680_vm1, %v5679_v52  ;;  %5231 = vmatprep.subr.bf16.mxu1 %v5679_v52 }
 0x2e9   :  { %v1763_v57 = vpop.trf.xlu0 }
 0x2ea   :  { %v1943_v45 = vpop.trf.xlu1 }
 0x2eb   :  { %5240 = vmatmul.mubr.msk.bf16.vlgmr.msra.gmra.mxu0 %vm1350_vm2, %v1943_v45  ;;  %v4473_v45 = vmul.f32 %v5973_v28, %v5973_v28 }
 0x2ec   :  { %5250 = vmatpush3.bf16.msra.mxu0 %v5601_v16  ;;  %5251 = vmatprep.mubr.msk.bf16.mxu0 %vm5680_vm1, %v5679_v52 }
 0x2ed   :  { %5261 = vmatprep.subr.bf16.mxu0 %v5679_v52  ;;  %v1883_v10 = vpop.trf.xlu0 }
 0x2ee   :  { %v2063_v43 = vpop.trf.xlu1  ;;  %5222 = vmatmul.mubr.msk.bf16.vlgmr.msra.gmra.mxu1 %vm1350_vm2, %v1763_v57 }
 0x2ef   :  { %5232 = vmatpush3.bf16.msra.mxu1 %v5602_v54  ;;  %5233 = vmatprep.mubr.msk.bf16.mxu1 %vm5680_vm1, %v5679_v52  ;;  %v4493_v54 = vmul.f32 %v6153_v24, %v6153_v24 }
 0x2f0   :  { %5243 = vmatprep.subr.bf16.mxu1 %v5679_v52 }
 0x2f1   :  { %v2003_v42 = vpop.trf.xlu0 }
 0x2f3   :  { %5252 = vmatmul.mubr.msk.bf16.vlgmr.msra.gmra.mxu0 %vm1350_vm2, %v2063_v43  ;;  %v4517_v43 = vsel %vm885_vm0, %v4477_v13, 0.0  ;;  %v4562_v13 = vsel %vm885_vm0, %v4492_v21, 0.0 }
 0x2f4   :  { %5262 = vmatpush3.bf16.msra.mxu0 %v5603_v40  ;;  %5263 = vmatprep.mubr.msk.bf16.mxu0 %vm5680_vm1, %v5679_v52  ;;  %v4505_v40 = vsel %vm885_vm0, %v4473_v45, 0.0  ;;  %v4478_v45 = vmul.f32 %v6097_v7, %v6097_v7 }
 0x2f5   :  { %5273 = vmatprep.subr.mxu0 %v5980_v11 }
 0x2f6   :  { %5234 = vmatmul.mubr.msk.bf16.vlgmr.msra.gmra.mxu1 %vm1350_vm2, %v1883_v10  ;;  %v4476_v10 = vmul.f32 %v5935_v29, %v5935_v29 }
 0x2f7   :  { %5244 = vmatpush3.bf16.msra.mxu1 %v5604_v32  ;;  %5245 = vmatprep.mubr.msk.bf16.mxu1 %vm5680_vm1, %v5679_v52 }
 0x2f8   :  { %5255 = vmatprep.subr.bf16.mxu1 %v5679_v52 }
 0x2fe   :  { %5246 = vmatmul.mubr.msk.bf16.vlgmr.msra.gmra.mxu1 %vm1350_vm2, %v2003_v42  ;;  %v4565_v42 = vsel %vm885_vm0, %v4493_v54, 0.0  ;;  %v4520_v54 = vsel %vm885_vm0, %v4478_v45, 0.0 }
 0x2ff   :  { %5256 = vmatpush3.bf16.msra.mxu1 %v5605_v26  ;;  %5257 = vmatprep.mubr.msk.bf16.mxu1 %vm5680_vm1, %v5679_v52  ;;  %v4514_v26 = vsel %vm885_vm0, %v4476_v10, 0.0 }
 0x300   :  { %5267 = vmatprep.subr.bf16.mxu1 %v5679_v52 }
 0x305   :  { %4509 = vadd.xlane.f32.xlu1 %v4508_v36 }
 0x309   :  { %4512 = vadd.xlane.f32.xlu1 %v4511_v17 }
 0x30d   :  { %4554 = vadd.xlane.f32.xlu1 %v4553_v15  ;;  %v4556_v15 = vsel %vm885_vm0, %v4490_v5, 0.0 }
 0x30f   :  { %v6347_v57 = vpop.trf.xlu0 }
 0x311   :  { %4560 = vadd.xlane.f32.xlu1 %v4559_v60  ;;  %v4495_v60 = vmul.f32 %v6204_v51, %v6204_v51 }
 0x312   :  { %v6345_v16 = vpop.trf.xlu1 }
 0x313   :  { %v2796_v36 = vpop.trf.xlu0 }
 0x314   :  { %4506 = vadd.xlane.f32.xlu0 %v4505_v40  ;;  %v4494_v40 = vmul.f32 %v6156_v61, %v6156_v61 }
 0x315   :  { %4518 = vadd.xlane.f32.xlu1 %v4517_v43  ;;  %v4481_v43 = vmul.f32 %v6058_v3, %v6058_v3 }
 0x316   :  { %v6355_v32 = vpop.trf.xlu1 }
 0x317   :  { %v4529_v10 = vsel %vm885_vm0, %v4481_v43, 0.0 }
 0x318   :  { %4515 = vadd.xlane.f32.xlu0 %v4514_v26 }
 0x319   :  { %4566 = vadd.xlane.f32.xlu1 %v4565_v42 }
 0x31a   :  { %v2183_v17 = vpop.trf.xlu1 }
 0x31b   :  { %5264 = vmatmul.mubr.msk.bf16.vlgmr.msra.gmra.mxu0 %vm1350_vm2, %v2183_v17  ;;  %v4503_v17 = vmul.f32 %v6254_v6, %v6254_v6 }
 0x31c   :  { %5274 = vmatpush3.msra.mxu0 %v5980_v11  ;;  %5277 = vmatprep.mubr.msk.f32.mxu0 %vm1350_vm2, %v6223_v27  ;;  %v5606_v27 = vld [vmem:[#allocation2 + $0x78] sm:$0xff]  }
 0x31d   :  { %5275 = vmatprep.subr.mxu0 %v5973_v28  ;;  %4524 = vadd.xlane.f32.xlu1 %v4523_v4  ;;  %v2123_v11 = vpop.trf.xlu0 }
 0x31e   :  { %4557 = vadd.xlane.f32.xlu0 %v4556_v15  ;;  %5276 = vmatpush3.msra.mxu0 %v5973_v28  ;;  %v4571_v28 = vsel %vm885_vm0, %v4495_v60, 0.0  ;;  %v4595_v60 = vsel %vm885_vm0, %v4503_v17, 0.0 }
 0x31f   :  { %5287 = vmatprep.subr.mxu0 %v6097_v7  ;;  %5258 = vmatmul.mubr.msk.bf16.vlgmr.msra.gmra.mxu1 %vm1350_vm2, %v2123_v11 }
 0x320   :  { %5268 = vmatpush3.bf16.msra.mxu1 %v5606_v27  ;;  %5269 = vmatprep.mubr.msk.bf16.mxu1 %vm5680_vm1, %v5679_v52 }
 0x321   :  { %5280 = vmatprep.subr.mxu1 %v5935_v29  ;;  %4572 = vadd.xlane.f32.xlu1 %v4571_v28  ;;  %v2243_v52 = vpop.trf.xlu0 }
 0x322   :  { %4563 = vadd.xlane.f32.xlu0 %v4562_v13  ;;  %v4488_v13 = vmul.f32 %v6165_v53, %v6165_v53 }
 0x323   :  { %5278 = vmatmul.mubr.msk.f32.vlgmr.msra.gmra.mxu0 %vm1350_vm2, %v6227_v31  ;;  %v4568_v31 = vsel %vm885_vm0, %v4494_v40, 0.0 }
 0x324   :  { %5288 = vmatpush3.msra.mxu0 %v6097_v7  ;;  %5291 = vmatprep.mubr.msk.f32.mxu0 %vm1350_vm2, %v6292_v2  ;;  %v4497_v7 = vmul.f32 %v6178_v46, %v6178_v46  ;;  %v4496_v2 = vmul.f32 %v6207_v19, %v6207_v19 }
 0x325   :  { %5289 = vmatprep.subr.mxu0 %v6094_v12  ;;  %4530 = vadd.xlane.f32.xlu1 %v4529_v10 }
 0x326   :  { %4521 = vadd.xlane.f32.xlu0 %v4520_v54  ;;  %5290 = vmatpush3.msra.mxu0 %v6094_v12  ;;  %v4480_v12 = vmul.f32 %v6003_v48, %v6003_v48  ;;  %v4504_v54 = vmul.f32 %v6257_v20, %v6257_v20 }
 0x327   :  { %5301 = vmatprep.subr.mxu0 %v6061_v56  ;;  %5270 = vmatmul.mubr.msk.bf16.vlgmr.msra.gmra.mxu1 %vm1350_vm2, %v2243_v52 }
 0x328   :  { %5292 = vmatmul.mubr.msk.f32.vlgmr.msra.gmra.mxu0 %vm1350_vm2, %v6297_v58  ;;  %5281 = vmatpush3.msra.mxu1 %v5935_v29  ;;  %v4577_v29 = vsel %vm885_vm0, %v4497_v7, 0.0  ;;  %v4574_v58 = vsel %vm885_vm0, %v4496_v2, 0.0 }
 0x329   :  { %5284 = vmatprep.mubr.msk.f32.mxu1 %vm1350_vm2, %v6225_v14  ;;  %5282 = vmatprep.subr.mxu1 %v5930_v62  ;;  %v4526_v14 = vsel %vm885_vm0, %v4480_v12, 0.0 }
 0x32a   :  { %4569 = vadd.xlane.f32.xlu0 %v4568_v31  ;;  %5283 = vmatpush3.msra.mxu1 %v5930_v62  ;;  %v4483_v62 = vmul.f32 %v6132_v38, %v6132_v38 }
 0x32b   :  { %5302 = vmatpush3.msra.mxu0 %v6061_v56  ;;  %5294 = vmatprep.subr.mxu1 %v6003_v48 }
 0x32c   :  { %5303 = vmatprep.subr.mxu0 %v6058_v3  ;;  %5305 = vmatprep.mubr.msk.f32.mxu0 %vm1350_vm2, %v6347_v57  ;;  %v4500_v57 = vmul.f32 %v6245_v50, %v6245_v50 }
 0x32d   :  { %4578 = vadd.xlane.f32.xlu1 %v4577_v29  ;;  %5304 = vmatpush3.msra.mxu0 %v6058_v3  ;;  %v4482_v3 = vmul.f32 %v6061_v56, %v6061_v56  ;;  %v4498_v56 = vmul.f32 %v6181_v39, %v6181_v39 }
 0x32e   :  { %4527 = vadd.xlane.f32.xlu0 %v4526_v14  ;;  %5315 = vmatprep.subr.mxu0 %v6085_v18  ;;  %v4586_v26 = vsel %vm885_vm0, %v4500_v57, 0.0 }
 0x32f   :  { %5306 = vmatmul.mubr.msk.f32.vlgmr.msra.gmra.mxu0 %vm1350_vm2, %v2796_v36  ;;  %5285 = vmatmul.mubr.msk.f32.vlgmr.msra.gmra.mxu1 %vm1350_vm2, %v6229_v22  ;;  %v4499_v22 = vmul.f32 %v6242_v1, %v6242_v1  ;;  %v4486_v36 = vmul.f32 %v6085_v18, %v6085_v18 }
 0x330   :  { %5316 = vmatpush3.msra.mxu0 %v6085_v18  ;;  %5295 = vmatpush3.msra.mxu1 %v6003_v48  ;;  %v4535_v48 = vsel %vm885_vm0, %v4483_v62, 0.0 }
 0x331   :  { %5298 = vmatprep.mubr.msk.f32.mxu1 %vm1350_vm2, %v6237_v44  ;;  %5296 = vmatprep.subr.mxu1 %v5992_v8  ;;  %v4583_v44 = vsel %vm885_vm0, %v4499_v22, 0.0  ;;  %v4544_v15 = vsel %vm885_vm0, %v4486_v36, 0.0 }
 0x332   :  { %4575 = vadd.xlane.f32.xlu0 %v4574_v58  ;;  %5297 = vmatpush3.msra.mxu1 %v5992_v8  ;;  %v4532_v8 = vsel %vm885_vm0, %v4482_v3, 0.0 }
 0x333   :  { %5317 = vmatprep.subr.mxu0 %v6082_v25  ;;  %5308 = vmatprep.subr.mxu1 %v6136_v30 }
 0x334   :  { %5299 = vmatmul.mubr.msk.f32.vlgmr.msra.gmra.mxu1 %vm1350_vm2, %v6259_v9  ;;  %4536 = vadd.xlane.f32.xlu1 %v4535_v48  ;;  %v4485_v9 = vmul.f32 %v6082_v25, %v6082_v25 }
 0x335   :  { %5309 = vmatpush3.msra.mxu1 %v6136_v30  ;;  %5318 = vmatpush3.msra.mxu0 %v6082_v25 }
 0x336   :  { %5310 = vmatprep.subr.mxu1 %v6132_v38  ;;  %5312 = vmatprep.mubr.msk.f32.mxu1 %vm1350_vm2, %v6299_v59  ;;  %v4484_v59 = vmul.f32 %v6136_v30, %v6136_v30  ;;  %v4541_v25 = vsel %vm885_vm0, %v4485_v9, 0.0 }
 0x337   :  { %5329 = vmatprep.subr.mxu0 %v6111_v47  ;;  %5311 = vmatpush3.msra.mxu1 %v6132_v38  ;;  %v4580_v38 = vsel %vm885_vm0, %v4498_v56, 0.0 }
 0x338   :  { %4533 = vadd.xlane.f32.xlu0 %v4532_v8  ;;  %5322 = vmatprep.subr.mxu1 %v6165_v53  ;;  %v4538_v30 = vsel %vm885_vm0, %v4484_v59, 0.0 }
 0x339   :  { %5313 = vmatmul.mubr.msk.f32.vlgmr.msra.gmra.mxu1 %vm1350_vm2, %v6302_v34  ;;  %4584 = vadd.xlane.f32.xlu1 %v4583_v44  ;;  %v4501_v34 = vmul.f32 %v6232_v0, %v6232_v0 }
 0x33a   :  { %5323 = vmatpush3.msra.mxu1 %v6165_v53  ;;  %5326 = vmatprep.mubr.msk.f32.mxu1 %vm1350_vm2, %v6345_v16  ;;  %v4550_v53 = vsel %vm885_vm0, %v4488_v13, 0.0 }
 0x33b   :  { %5324 = vmatprep.subr.mxu1 %v6150_v23 }
 0x33c   :  { %5325 = vmatpush3.msra.mxu1 %v6150_v23  ;;  %4581 = vadd.xlane.f32.xlu0 %v4580_v38 }
 0x33d   :  { %5336 = vmatprep.subr.mxu1 %v6191_v35  ;;  %5327 = vmatmul.mubr.msk.f32.vlgmr.msra.gmra.mxu1 %vm1350_vm2, %v6355_v32  ;;  %v4589_v32 = vsel %vm885_vm0, %v4501_v34, 0.0 }
 0x33e   :  { %5337 = vmatpush3.msra.mxu1 %v6191_v35  ;;  %4542 = vadd.xlane.f32.xlu1 %v4541_v25  ;;  %v3360_v16 = vpop.trf.xlu1  ;;  %v4487_v35 = vmul.f32 %v6150_v23, %v6150_v23 }
 0x33f   :  { %5338 = vmatprep.subr.mxu1 %v6188_v49  ;;  %5340 = vmatprep.mubr.msk.f32.mxu1 %vm1350_vm2, %v3360_v16  ;;  %v3021_v42 = vpop.trf.xlu0 }
 0x340   :  { %5339 = vmatpush3.msra.mxu1 %v6188_v49  ;;  %4539 = vadd.xlane.f32.xlu0 %v4538_v30  ;;  %v4547_v23 = vsel %vm885_vm0, %v4487_v35, 0.0 }
 0x341   :  { %5350 = vmatprep.subr.mxu1 %v6207_v19  ;;  %5319 = vmatprep.mubr.msk.f32.mxu0 %vm1350_vm2, %v3021_v42 }
 0x342   :  { %4590 = vadd.xlane.f32.xlu1 %v4589_v32  ;;  %v3361_v63 = vpop.trf.xlu1 }
 0x343   :  { %5341 = vmatmul.mubr.msk.f32.vlgmr.msra.gmra.mxu1 %vm1350_vm2, %v3361_v63  ;;  %v1448_v49 = vpop.f32.mrf.mxu1  ;;  %v3022_v5 = vpop.trf.xlu0 }
 0x344   :  { %4587 = vadd.xlane.f32.xlu0 %v4586_v26  ;;  %5351 = vmatpush3.msra.mxu1 %v6207_v19  ;;  %2297 = vst [vmem:[%s6900_s4 + $0x10] sm:$0xff] %v1448_v49  ;;  %v4502_v19 = vmul.f32 %v6235_v55, %v6235_v55 }
 0x345   :  { %5352 = vmatprep.subr.mxu1 %v6204_v51  ;;  %v5187_v4 = vpop.f32.mrf.mxu1  ;;  %5320 = vmatmul.mubr.msk.f32.vlgmr.msra.gmra.mxu0 %vm1350_vm2, %v3022_v5 }
 0x346   :  { %4548 = vadd.xlane.f32.xlu1 %v4547_v23  ;;  %v3586_v18 = vpop.trf.xlu1  ;;  %5330 = vmatpush3.msra.mxu0 %v6111_v47  ;;  %v4592_v27 = vsel %vm885_vm0, %v4502_v19, 0.0 }
 0x347   :  { %5353 = vmatpush3.msra.mxu1 %v6204_v51  ;;  %v1451_v21 = vpop.f32.mrf.mxu1  ;;  %5331 = vmatprep.subr.mxu0 %v6108_v33  ;;  %v3247_v11 = vpop.trf.xlu0 }
 0x348   :  { %4545 = vadd.xlane.f32.xlu0 %v4544_v15  ;;  %2298 = vst [vmem:[%s6900_s4 + $0x18] sm:$0x3] %v1451_v21  ;;  %5332 = vmatpush3.msra.mxu0 %v6108_v33 }
 0x349   :  { %5364 = vmatprep.subr.mxu1 %v6245_v50  ;;  %v5188_v47 = vpop.f32.mrf.mxu1  ;;  %5343 = vmatprep.subr.mxu0 %v6156_v61 }
 0x34a   :  { %4596 = vadd.xlane.f32.xlu1 %v4595_v60  ;;  %v3587_v51 = vpop.trf.xlu1  ;;  %5333 = vmatprep.mubr.msk.f32.mxu0 %vm1350_vm2, %v3247_v11  ;;  %v1388_v33 = vpop.f32.mrf.mxu0 }
 0x34b   :  { %5354 = vmatprep.mubr.msk.f32.mxu1 %vm1350_vm2, %v3586_v18  ;;  %v3248_v45 = vpop.trf.xlu0  ;;  %2295 = vst [vmem:[%s6900_s4] sm:$0xff] %v1388_v33 }
 0x34c   :  { %4593 = vadd.xlane.f32.xlu0 %v4592_v27  ;;  %5355 = vmatmul.mubr.msk.f32.vlgmr.msra.gmra.mxu1 %vm1350_vm2, %v3587_v51  ;;  %v5181_v43 = vpop.f32.mrf.mxu0 }
 0x34d   :  { %5365 = vmatpush3.msra.mxu1 %v6245_v50  ;;  %5334 = vmatmul.mubr.msk.f32.vlgmr.msra.gmra.mxu0 %vm1350_vm2, %v3248_v45 }
 0x34e   :  { %5366 = vmatprep.subr.mxu1 %v6242_v1  ;;  %v3812_v28 = vpop.trf.xlu1  ;;  %5344 = vmatpush3.msra.mxu0 %v6156_v61  ;;  %v1391_v50 = vpop.f32.mrf.mxu0 }
 0x34f   :  { %5367 = vmatpush3.msra.mxu1 %v6242_v1  ;;  %5345 = vmatprep.subr.mxu0 %v6153_v24  ;;  %v3473_v52 = vpop.trf.xlu0  ;;  %2296 = vst [vmem:[%s6900_s4 + $0x8] sm:$0x3] %v1391_v50  ;;  %v4598_v1 = vsel %vm885_vm0, %v4504_v54, 0.0 }
 0x350   :  { %4551 = vadd.xlane.f32.xlu0 %v4550_v53  ;;  %5346 = vmatpush3.msra.mxu0 %v6153_v24  ;;  %v5182_v40 = vpop.f32.mrf.mxu0 }
 0x351   :  { %5378 = vmatprep.subr.mxu1 %v6257_v20  ;;  %5357 = vmatprep.subr.mxu0 %v6181_v39 }
 0x352   :  { %5347 = vmatprep.mubr.msk.f32.mxu0 %vm1350_vm2, %v3473_v52  ;;  %v3813_v61 = vpop.trf.xlu1  ;;  %5368 = vmatprep.mubr.msk.f32.mxu1 %vm1350_vm2, %v3812_v28 }
 0x353   :  { %5369 = vmatmul.mubr.msk.f32.vlgmr.msra.gmra.mxu1 %vm1350_vm2, %v3813_v61  ;;  %v3474_v24 = vpop.trf.xlu0 }
 0x354   :  { %4599 = vadd.xlane.f32.xlu0 %v4598_v1  ;;  %5379 = vmatpush3.msra.mxu1 %v6257_v20 }
 0x355   :  { %5348 = vmatmul.mubr.msk.f32.vlgmr.msra.gmra.mxu0 %vm1350_vm2, %v3474_v24  ;;  %5380 = vmatprep.subr.mxu1 %v6254_v6 }
 0x356   :  { %v4038_v10 = vpop.trf.xlu1  ;;  %5358 = vmatpush3.msra.mxu0 %v6181_v39  ;;  %5381 = vmatpush3.msra.mxu1 %v6254_v6 }
 0x357   :  { %5359 = vmatprep.subr.mxu0 %v6178_v46  ;;  %5382 = vmatprep.mubr.msk.f32.mxu1 %vm1350_vm2, %v4038_v10  ;;  %v3699_v7 = vpop.trf.xlu0 }
 0x358   :  { %5360 = vmatpush3.msra.mxu0 %v6178_v46  ;;  %5361 = vmatprep.mubr.msk.f32.mxu0 %vm1350_vm2, %v3699_v7 }
 0x359   :  { %5371 = vmatprep.subr.mxu0 %v6235_v55 }
 0x35a   :  { %v4039_v20 = vpop.trf.xlu1 }
 0x35b   :  { %5383 = vmatmul.mubr.msk.f32.vlgmr.msra.gmra.mxu1 %vm1350_vm2, %v4039_v20  ;;  %v3700_v31 = vpop.trf.xlu0 }
 0x35c   :  { %5362 = vmatmul.mubr.msk.f32.vlgmr.msra.gmra.mxu0 %vm1350_vm2, %v3700_v31 }
 0x35d   :  { %5372 = vmatpush3.msra.mxu0 %v6235_v55 }
 0x35e   :  { %5373 = vmatprep.subr.mxu0 %v6232_v0 }
 0x35f   :  { %5374 = vmatpush3.msra.mxu0 %v6232_v0  ;;  %v3925_v39 = vpop.trf.xlu0 }
 0x360   :  { %5375 = vmatprep.mubr.msk.f32.mxu0 %vm1350_vm2, %v3925_v39 }
 0x363   :  { %v3926_v46 = vpop.trf.xlu0 }
 0x364   :  { %5376 = vmatmul.mubr.msk.f32.vlgmr.msra.gmra.mxu0 %vm1350_vm2, %v3926_v46 }
 0x376   :  { %v1568_v6 = vpop.f32.mrf.mxu1 }
 0x377   :  { %2301 = vst [vmem:[%s6900_s4 + $0x30] sm:$0xff] %v1568_v6 }
 0x378   :  { %v5199_v12 = vpop.f32.mrf.mxu1 }
 0x37a   :  { %v1508_v29 = vpop.f32.mrf.mxu0  ;;  %v1571_v14 = vpop.f32.mrf.mxu1 }
 0x37b   :  { %2299 = vst [vmem:[%s6900_s4 + $0x20] sm:$0xff] %v1508_v29  ;;  %2302 = vst [vmem:[%s6900_s4 + $0x38] sm:$0x3] %v1571_v14 }
 0x37c   :  { %v5193_v0 = vpop.f32.mrf.mxu0  ;;  %v5200_v55 = vpop.f32.mrf.mxu1 }
 0x37e   :  { %v1511_v2 = vpop.f32.mrf.mxu0 }
 0x37f   :  { %2300 = vst [vmem:[%s6900_s4 + $0x28] sm:$0x3] %v1511_v2 }
 0x380   :  { %v5194_v62 = vpop.f32.mrf.mxu0 }
 0x382   :  { %v1628_v58 = vpop.f32.mrf.mxu0 }
 0x383   :  { %2303 = vst [vmem:[%s6900_s4 + $0x40] sm:$0xff] %v1628_v58 }
 0x384   :  { %v5205_v3 = vpop.f32.mrf.mxu0 }
 0x386   :  { %v1631_v48 = vpop.f32.mrf.mxu0 }
 0x387   :  { %2304 = vst [vmem:[%s6900_s4 + $0x48] sm:$0x3] %v1631_v48 }
 0x388   :  { %v5206_v22 = vpop.f32.mrf.mxu0 }
 0x38a   :  { %v1748_v8 = vpop.f32.mrf.mxu0 }
 0x38b   :  { %2307 = vst [vmem:[%s6900_s4 + $0x60] sm:$0xff] %v1748_v8 }
 0x38c   :  { %v5217_v56 = vpop.f32.mrf.mxu0 }
 0x38e   :  { %v1751_v44 = vpop.f32.mrf.mxu0  ;;  %v6624_v45 = vpop.xlane.xlu1 %4509 }
 0x38f   :  { %2308 = vst [vmem:[%s6900_s4 + $0x68] sm:$0x3] %v1751_v44 }
 0x390   :  { %v5218_v9 = vpop.f32.mrf.mxu0 }
 0x392   :  { %v1868_v38 = vpop.f32.mrf.mxu0  ;;  %v6628_v43 = vpop.xlane.xlu1 %4512 }
 0x393   :  { %2311 = vst [vmem:[%s6900_s4 + $0x80] sm:$0xff] %v1868_v38 }
 0x394   :  { %v5229_v59 = vpop.f32.mrf.mxu0 }
 0x396   :  { %v1871_v25 = vpop.f32.mrf.mxu0  ;;  %v6632_v54 = vpop.xlane.xlu1 %4554 }
 0x397   :  { %2312 = vst [vmem:[%s6900_s4 + $0x88] sm:$0x3] %v1871_v25 }
 0x398   :  { %v5230_v34 = vpop.f32.mrf.mxu0 }
 0x39a   :  { %v6639_v40 = vpop.xlane.xlu1 %4560 }
 0x39d   :  { %v6622_v33 = vpop.xlane.xlu0 %4506 }
 0x39e   :  { %v6649_v39 = vpop.xlane.xlu1 %4518 }
 0x3a1   :  { %v6626_v28 = vpop.xlane.xlu0 %4515 }
 0x3a2   :  { %v6659_v14 = vpop.xlane.xlu1 %4566 }
 0x3a6   :  { %v1688_v16 = vpop.f32.mrf.mxu1  ;;  %v6666_v3 = vpop.xlane.xlu1 %4524 }
 0x3a7   :  { %2305 = vst [vmem:[%s6900_s4 + $0x50] sm:$0xff] %v1688_v16  ;;  %v6630_v53 = vpop.xlane.xlu0 %4557 }
 0x3a8   :  { %v5211_v30 = vpop.f32.mrf.mxu1 }
 0x3aa   :  { %v1691_v32 = vpop.f32.mrf.mxu1 }
 0x3ab   :  { %v1988_v57 = vpop.f32.mrf.mxu0  ;;  %2306 = vst [vmem:[%s6900_s4 + $0x58] sm:$0x3] %v1691_v32  ;;  %v6637_v52 = vpop.xlane.xlu0 %4563 }
 0x3ac   :  { %2315 = vst [vmem:[%s6900_s4 + $0xa0] sm:$0xff] %v1988_v57  ;;  %v5212_v35 = vpop.f32.mrf.mxu1  ;;  %v6672_v57 = vpop.xlane.xlu1 %4572 }
 0x3ad   :  { %v5241_v42 = vpop.f32.mrf.mxu0 }
 0x3ae   :  { %v1808_v26 = vpop.f32.mrf.mxu1 }
 0x3af   :  { %v1991_v63 = vpop.f32.mrf.mxu0  ;;  %2309 = vst [vmem:[%s6900_s4 + $0x70] sm:$0xff] %v1808_v26  ;;  %v6647_v20 = vpop.xlane.xlu0 %4521 }
 0x3b0   :  { %2316 = vst [vmem:[%s6900_s4 + $0xa8] sm:$0x3] %v1991_v63  ;;  %v5223_v49 = vpop.f32.mrf.mxu1 }
 0x3b1   :  { %v5242_v36 = vpop.f32.mrf.mxu0 }
 0x3b2   :  { %v1811_v5 = vpop.f32.mrf.mxu1 }
 0x3b3   :  { %v2108_v23 = vpop.f32.mrf.mxu0  ;;  %2310 = vst [vmem:[%s6900_s4 + $0x78] sm:$0x3] %v1811_v5  ;;  %v6654_v12 = vpop.xlane.xlu0 %4569 }
 0x3b4   :  { %2319 = vst [vmem:[%s6900_s4 + $0xc0] sm:$0xff] %v2108_v23  ;;  %v5224_v4 = vpop.f32.mrf.mxu1 }
 0x3b5   :  { %v5253_v17 = vpop.f32.mrf.mxu0 }
 0x3b6   :  { %v1928_v15 = vpop.f32.mrf.mxu1  ;;  %v6679_v17 = vpop.xlane.xlu1 %4530 }
 0x3b7   :  { %v2111_v18 = vpop.f32.mrf.mxu0  ;;  %2313 = vst [vmem:[%s6900_s4 + $0x90] sm:$0xff] %v1928_v15  ;;  %v6664_v62 = vpop.xlane.xlu0 %4527 }
 0x3b8   :  { %2320 = vst [vmem:[%s6900_s4 + $0xc8] sm:$0x3] %v2111_v18  ;;  %v5235_v21 = vpop.f32.mrf.mxu1 }
 0x3b9   :  { %v5254_v19 = vpop.f32.mrf.mxu0 }
 0x3ba   :  { %v1931_v60 = vpop.f32.mrf.mxu1 }
 0x3bb   :  { %2314 = vst [vmem:[%s6900_s4 + $0x98] sm:$0x3] %v1931_v60  ;;  %v6669_v59 = vpop.xlane.xlu0 %4575 }
 0x3bc   :  { %v5236_v11 = vpop.f32.mrf.mxu1 }
 0x3be   :  { %v2048_v47 = vpop.f32.mrf.mxu1 }
 0x3bf   :  { %2317 = vst [vmem:[%s6900_s4 + $0xb0] sm:$0xff] %v2048_v47 }
 0x3c0   :  { %v5247_v51 = vpop.f32.mrf.mxu1 }
 0x3c1   :  { %v6676_v49 = vpop.xlane.xlu0 %4533 }
 0x3c2   :  { %v2051_v27 = vpop.f32.mrf.mxu1 }
 0x3c3   :  { %2318 = vst [vmem:[%s6900_s4 + $0xb8] sm:$0x3] %v2051_v27 }
 0x3c4   :  { %v5248_v13 = vpop.f32.mrf.mxu1 }
 0x3c5   :  { %v6683_v11 = vpop.xlane.xlu0 %4581 }
 0x3db   :  { %v2228_v50 = vpop.f32.mrf.mxu0 }
 0x3dc   :  { %2323 = vst [vmem:[%s6900_s4 + $0xe0] sm:$0xff] %v2228_v50  ;;  %v6686_v50 = vpop.xlane.xlu1 %4578 }
 0x3dd   :  { %v5265_v61 = vpop.f32.mrf.mxu0 }
 0x3df   :  { %v2231_v1 = vpop.f32.mrf.mxu0  ;;  %v2168_v24 = vpop.f32.mrf.mxu1 }
 0x3e0   :  { %2324 = vst [vmem:[%s6900_s4 + $0xe8] sm:$0x3] %v2231_v1  ;;  %2321 = vst [vmem:[%s6900_s4 + $0xd0] sm:$0xff] %v2168_v24 }
 0x3e1   :  { %v5266_v10 = vpop.f32.mrf.mxu0  ;;  %v5259_v7 = vpop.f32.mrf.mxu1 }
 0x3e3   :  { %v2171_v31 = vpop.f32.mrf.mxu1  ;;  %v5279_v55 = vpop.f32.mrf.mxu0 }
 0x3e4   :  { %2322 = vst [vmem:[%s6900_s4 + $0xd8] sm:$0x3] %v2171_v31  ;;  %v4136_v56 = vmul.f32 %v5279_v55, %v5279_v55 }
 0x3e5   :  { %v5260_v46 = vpop.f32.mrf.mxu1  ;;  %v2431_v22 = vpop.f32.mrf.mxu0 }
 0x3e6   :  { %v4135_v25 = vmul.f32 %v2431_v22, %v2431_v22  ;;  %v4171_v42 = vsel %vm4170_vm3, %v4136_v56, 0.0  ;;  %v6690_v46 = vpop.xlane.xlu0 %4539 }
 0x3e7   :  { %v2288_v6 = vpop.f32.mrf.mxu1 }
 0x3e8   :  { %2325 = vst [vmem:[%s6900_s4 + $0xf0] sm:$0xff] %v2288_v6  ;;  %v5293_v16 = vpop.f32.mrf.mxu0  ;;  %v4167_v63 = vsel %vm885_vm0, %v4135_v25, 0.0 }
 0x3e9   :  { %v5271_v29 = vpop.f32.mrf.mxu1  ;;  %v4140_v23 = vmul.f32 %v5293_v16, %v5293_v16 }
 0x3ea   :  { %v2657_v26 = vpop.f32.mrf.mxu0  ;;  %v6697_v56 = vpop.xlane.xlu0 %4587 }
 0x3eb   :  { %v2291_v0 = vpop.f32.mrf.mxu1  ;;  %v4139_v4 = vmul.f32 %v2657_v26, %v2657_v26  ;;  %v4183_v60 = vsel %vm4170_vm3, %v4140_v23, 0.0 }
 0x3ec   :  { %2326 = vst [vmem:[%s6900_s4 + $0xf8] sm:$0x3] %v2291_v0  ;;  %v6693_v0 = vpop.xlane.xlu1 %4536  ;;  %s5681_s4 = smov [#allocation7]  }
 0x3ed   :  { %v5272_v2 = vpop.f32.mrf.mxu1  ;;  %v4180_v51 = vsel %vm885_vm0, %v4139_v4, 0.0  ;;  %s4845_s14 = sshll.u32 %s5681_s4, 4  ;;  %s4846_s14 = int_to_ptr.vmem [resolvable:$true] %s4845_s14 }
 0x3ee   :  { %s5647_s15 = scalar_lea.vmem %s4846_s14, 16  ;;  %s5651_s16 = scalar_lea.vmem %s4846_s14, 32 }
 0x3ef   :  { %v5286_v58 = vpop.f32.mrf.mxu1  ;;  %v5307_v15 = vpop.f32.mrf.mxu0  ;;  %p5648_p10 = scmp.ne.s32.totalorder %s4846_s14, %s5647_s15  ;;  %p5652_p11 = scmp.lt.s32.totalorder %s4846_s14, %s4846_s14 }
 0x3f0   :  { %v4138_v48 = vmul.f32 %v5286_v58, %v5286_v58  ;;  %v4144_v61 = vmul.f32 %v5307_v15, %v5307_v15  ;;  %v6700_v16 = vpop.xlane.xlu1 %4584  ;;  %p5653_p12 = scmp.lt.s32.totalorder %s5651_s16, %s5647_s15 }
 0x3f1   :  { %v2544_v8 = vpop.f32.mrf.mxu1  ;;  %v2883_v27 = vpop.f32.mrf.mxu0 }
 0x3f2   :  { %v4137_v44 = vmul.f32 %v2544_v8, %v2544_v8  ;;  %v4177_v9 = vsel %vm4170_vm3, %v4138_v48, 0.0  ;;  %v4143_v24 = vmul.f32 %v2883_v27, %v2883_v27  ;;  %v4195_v29 = vsel %vm4170_vm3, %v4144_v61, 0.0  ;;  %p5654_p13 = por %p5653_p12, %p5652_p11 }
 0x3f3   :  { %4178 = vadd.xlane.f32.xlu0 %v4177_v9 }
 0x3f4   :  { %v5300_v38 = vpop.f32.mrf.mxu1  ;;  %v4174_v34 = vsel %vm885_vm0, %v4137_v44, 0.0  ;;  %v4192_v2 = vsel %vm885_vm0, %v4143_v24, 0.0  ;;  %p5655_p0 = pnand %p5654_p13, %p5648_p10 }
 0x3f5   :  { %4175 = vadd.xlane.f32.xlu1 %v4174_v34  ;;  %v4142_v32 = vmul.f32 %v5300_v38, %v5300_v38 }
 0x3f6   :  { %v2770_v30 = vpop.f32.mrf.mxu1 }
 0x3f7   :  { %4172 = vadd.xlane.f32.xlu0 %v4171_v42  ;;  %v4141_v35 = vmul.f32 %v2770_v30, %v2770_v30  ;;  %v4189_v5 = vsel %vm4170_vm3, %v4142_v32, 0.0 }
 0x3f9   :  { %v5314_v36 = vpop.f32.mrf.mxu1  ;;  %4168 = vadd.xlane.f32.xlu1 %v4167_v63  ;;  %v4186_v18 = vsel %vm885_vm0, %v4141_v35, 0.0 }
 0x3fa   :  { %v4146_v21 = vmul.f32 %v5314_v36, %v5314_v36  ;;  %v6705_v36 = vpop.xlane.xlu0 %4545 }
 0x3fb   :  { %4190 = vadd.xlane.f32.xlu0 %v4189_v5  ;;  %v2996_v19 = vpop.f32.mrf.mxu1  ;;  %v6707_v5 = vpop.xlane.xlu1 %4542 }
 0x3fc   :  { %v4145_v47 = vmul.f32 %v2996_v19, %v2996_v19  ;;  %v4201_v1 = vsel %vm4170_vm3, %v4146_v21, 0.0 }
 0x3fd   :  { %4187 = vadd.xlane.f32.xlu1 %v4186_v18  ;;  %v5328_v13 = vpop.f32.mrf.mxu1 }
 0x3fe   :  { %v4198_v10 = vsel %vm885_vm0, %v4145_v47, 0.0  ;;  %v4150_v6 = vmul.f32 %v5328_v13, %v5328_v13  ;;  %v6711_v47 = vpop.xlane.xlu0 %4593 }
 0x3ff   :  { %4184 = vadd.xlane.f32.xlu0 %v4183_v60  ;;  %v3222_v7 = vpop.f32.mrf.mxu1 }
 0x400   :  { %v4149_v55 = vmul.f32 %v3222_v7, %v3222_v7  ;;  %v4213_v8 = vsel %vm4170_vm3, %v4150_v6, 0.0  ;;  %v4645_v7 = vrot.slane %v6628_v43, %v5770_v37  ;;  %v6721_v6 = vpop.xlane.xlu1 %4590  ;;  %v4636_v43 = vrot.slane %v6622_v33, %v5770_v37 }
 0x401   :  { %4181 = vadd.xlane.f32.xlu1 %v4180_v51 }
 0x402   :  { %v4210_v9 = vsel %vm885_vm0, %v4149_v55, 0.0 }
 0x403   :  { %4202 = vadd.xlane.f32.xlu0 %v4201_v1  ;;  %v5342_v48 = vpop.f32.mrf.mxu1 }
 0x404   :  { %v4154_v38 = vmul.f32 %v5342_v48, %v5342_v48  ;;  %v4730_v48 = vrot.slane %v6654_v12, %v5774_v41  ;;  %v4654_v12 = vrot.slane %v6649_v39, %v5770_v37 }
 0x405   :  { %4199 = vadd.xlane.f32.xlu1 %v4198_v10  ;;  %v5321_v31 = vpop.f32.mrf.mxu0  ;;  %v3448_v34 = vpop.f32.mrf.mxu1  ;;  %v4640_v10 = vrot.slane %v6624_v45, %v5774_v41  ;;  %v4708_v45 = vrot.slane %v6632_v54, %v5770_v37  ;;  %v4739_v54 = vrot.slane %v6669_v59, %v5774_v41 }
 0x406   :  { %v4148_v22 = vmul.f32 %v5321_v31, %v5321_v31  ;;  %v4153_v32 = vmul.f32 %v3448_v34, %v3448_v34  ;;  %v4225_v35 = vsel %vm4170_vm3, %v4154_v38, 0.0  ;;  %v4649_v31 = vrot.slane %v6626_v28, %v5774_v41 }
 0x407   :  { %4196 = vadd.xlane.f32.xlu0 %v4195_v29  ;;  %v3109_v58 = vpop.f32.mrf.mxu0  ;;  %v4721_v29 = vrot.slane %v6637_v52, %v5774_v41  ;;  %v4658_v28 = vrot.slane %v6647_v20, %v5774_v41  ;;  %v4726_v38 = vrot.slane %v6659_v14, %v5770_v37  ;;  %v4667_v14 = vrot.slane %v6664_v62, %v5774_v41 }
 0x408   :  { %v4147_v44 = vmul.f32 %v3109_v58, %v3109_v58  ;;  %v4207_v30 = vsel %vm4170_vm3, %v4148_v22, 0.0  ;;  %v4222_v18 = vsel %vm885_vm0, %v4153_v32, 0.0  ;;  %v4650_v20 = vsel %vm4307_vm4, %v4649_v31, %v4645_v7 }
 0x409   :  { %4193 = vadd.xlane.f32.xlu1 %v4192_v2  ;;  %v4659_v32 = vsel %vm4307_vm4, %v4658_v28, %v4654_v12  ;;  %v4731_v39 = vsel %vm4307_vm4, %v4730_v48, %v4726_v38  ;;  %v4672_v62 = vrot.slane %v6679_v17, %v5770_v37  ;;  %v4681_v28 = vrot.slane %v6693_v0, %v5770_v37 }
 0x40a   :  { %v4204_v42 = vsel %vm885_vm0, %v4147_v44, 0.0  ;;  %v4712_v44 = vrot.slane %v6630_v53, %v5774_v41 }
 0x40b   :  { %4214 = vadd.xlane.f32.xlu0 %v4213_v8  ;;  %v4717_v8 = vrot.slane %v6639_v40, %v5770_v37  ;;  %v4735_v40 = vrot.slane %v6672_v57, %v5770_v37 }
 0x40c   :  { %v5356_v26 = vpop.f32.mrf.mxu1 }
 0x40d   :  { %4211 = vadd.xlane.f32.xlu1 %v4210_v9  ;;  %v5335_v25 = vpop.f32.mrf.mxu0  ;;  %v4158_v15 = vmul.f32 %v5356_v26, %v5356_v26  ;;  %v6740_v9 = vpop.xlane.xlu0 %4551  ;;  %v4722_v53 = vsel %vm4307_vm4, %v4721_v29, %v4717_v8  ;;  %v4740_v26 = vsel %vm4307_vm4, %v4739_v54, %v4735_v40 }
 0x40e   :  { %v4152_v23 = vmul.f32 %v5335_v25, %v5335_v25  ;;  %v3674_v21 = vpop.f32.mrf.mxu1  ;;  %v4703_v0 = vrot.slane %v6740_v9, %v5774_v41 }
 0x40f   :  { %4208 = vadd.xlane.f32.xlu0 %v4207_v30  ;;  %v3335_v63 = vpop.f32.mrf.mxu0  ;;  %v4157_v51 = vmul.f32 %v3674_v21, %v3674_v21  ;;  %v4237_v13 = vsel %vm4170_vm3, %v4158_v15, 0.0  ;;  %v4641_v30 = vsel %vm4307_vm4, %v4640_v10, %v4636_v43  ;;  %v4748_v15 = vrot.slane %v6683_v11, %v5774_v41 }
 0x410   :  { %v4151_v4 = vmul.f32 %v3335_v63, %v3335_v63  ;;  %v4219_v60 = vsel %vm4170_vm3, %v4152_v23, 0.0  ;;  %v4713_v63 = vsel %vm4307_vm4, %v4712_v44, %v4708_v45  ;;  %v4676_v11 = vrot.slane %v6676_v49, %v5774_v41 }
 0x411   :  { %4205 = vadd.xlane.f32.xlu1 %v4204_v42  ;;  %v4234_v2 = vsel %vm885_vm0, %v4157_v51, 0.0  ;;  %v6758_v42 = vpop.xlane.xlu1 %4548  ;;  %v4757_v10 = vrot.slane %v6697_v56, %v5774_v41  ;;  %v4766_v49 = vrot.slane %v6711_v47, %v5774_v41  ;;  %v4694_v47 = vrot.slane %v6705_v36, %v5774_v41 }
 0x412   :  { %v4216_v27 = vsel %vm885_vm0, %v4151_v4, 0.0  ;;  %v4784_v4 = vsel %vm4444_vm5, %v4722_v53, %v4713_v63  ;;  %v4677_v48 = vsel %vm4307_vm4, %v4676_v11, %v4672_v62 }
 0x413   :  { %4226 = vadd.xlane.f32.xlu0 %v4225_v35  ;;  %v5370_v1 = vpop.f32.mrf.mxu1  ;;  %v4777_v35 = vsel %vm4444_vm5, %v4650_v20, %v4641_v30  ;;  %v4785_v21 = vsel %vm4446_vm6, %v4731_v39, %v4784_v4 }
 0x414   :  { %v4162_v58 = vmul.f32 %v5370_v1, %v5370_v1  ;;  %v4786_v17 = vsel %vm4448_vm7, %v4740_v26, %v4785_v21 }
 0x415   :  { %v5349_v19 = vpop.f32.mrf.mxu0  ;;  %4223 = vadd.xlane.f32.xlu1 %v4222_v18  ;;  %v3900_v52 = vpop.f32.mrf.mxu1  ;;  %v4663_v18 = vrot.slane %v6666_v3, %v5770_v37  ;;  %v4744_v3 = vrot.slane %v6686_v50, %v5770_v37  ;;  %v4685_v50 = vrot.slane %v6690_v46, %v5774_v41  ;;  %v4762_v46 = vrot.slane %v6721_v6, %v5770_v37 }
 0x416   :  { %v4156_v24 = vmul.f32 %v5349_v19, %v5349_v19  ;;  %v4161_v25 = vmul.f32 %v3900_v52, %v3900_v52  ;;  %v4249_v34 = vsel %vm4170_vm3, %v4162_v58, 0.0  ;;  %v4778_v19 = vsel %vm4446_vm6, %v4659_v32, %v4777_v35 }
 0x417   :  { %4220 = vadd.xlane.f32.xlu0 %v4219_v60  ;;  %v3561_v61 = vpop.f32.mrf.mxu0  ;;  %v4600_v60 = vpop.xlane.xlu0 %4599  ;;  %v4749_v29 = vsel %vm4307_vm4, %v4748_v15, %v4744_v3  ;;  %v4690_v52 = vrot.slane %v6707_v5, %v5770_v37  ;;  %v4699_v6 = vrot.slane %v6758_v42, %v5770_v37  ;;  %v4767_v36 = vsel %vm4307_vm4, %v4766_v49, %v4762_v46 }
 0x418   :  { %v4155_v55 = vmul.f32 %v3561_v61, %v3561_v61  ;;  %v4231_v33 = vsel %vm4170_vm3, %v4156_v24, 0.0  ;;  %v4753_v24 = vrot.slane %v6700_v16, %v5770_v37  ;;  %v4787_v54 = vsel %vm4450_vm8, %v4749_v29, %v4786_v17 }
 0x419   :  { %4217 = vadd.xlane.f32.xlu1 %v4216_v27  ;;  %v4246_v27 = vsel %vm885_vm0, %v4161_v25, 0.0  ;;  %v4695_v9 = vsel %vm4307_vm4, %v4694_v47, %v4690_v52 }
 0x41a   :  { %v4228_v59 = vsel %vm885_vm0, %v4155_v55, 0.0  ;;  %v4597_v55 = vpop.xlane.xlu1 %4596  ;;  %v4758_v8 = vsel %vm4307_vm4, %v4757_v10, %v4753_v24 }
 0x41b   :  { %4238 = vadd.xlane.f32.xlu0 %v4237_v13  ;;  %v4668_v13 = vsel %vm4307_vm4, %v4667_v14, %v4663_v18  ;;  %v5384_v1 = vpop.f32.mrf.mxu1  ;;  %v4771_v44 = vrot.slane %v4597_v55, %v5770_v37  ;;  %v4788_v53 = vsel %vm4452_vm9, %v4758_v8, %v4787_v54 }
 0x41c   :  { %v5363_v22 = vpop.f32.mrf.mxu0  ;;  %v4166_v56 = vmul.f32 %v5384_v1, %v5384_v1  ;;  %v4779_v40 = vsel %vm4448_vm7, %v4668_v13, %v4778_v19 }
 0x41d   :  { %4235 = vadd.xlane.f32.xlu1 %v4234_v2  ;;  %v4160_v23 = vmul.f32 %v5363_v22, %v5363_v22  ;;  %v4775_v2 = vrot.slane %v4600_v60, %v5774_v41  ;;  %v4126_v22 = vpop.f32.mrf.mxu1  ;;  %v4780_v25 = vsel %vm4450_vm8, %v4677_v48, %v4779_v40 }
 0x41e   :  { %v3787_v57 = vpop.f32.mrf.mxu0  ;;  %v4165_v20 = vmul.f32 %v4126_v22, %v4126_v22  ;;  %v4261_v12 = vsel %vm4170_vm3, %v4166_v56, 0.0 }
 0x41f   :  { %4232 = vadd.xlane.f32.xlu0 %v4231_v33  ;;  %v4159_v51 = vmul.f32 %v3787_v57, %v3787_v57  ;;  %v4243_v31 = vsel %vm4170_vm3, %v4160_v23, 0.0  ;;  %v4686_v33 = vsel %vm4307_vm4, %v4685_v50, %v4681_v28  ;;  %v4776_v38 = vsel %vm4307_vm4, %v4775_v2, %v4771_v44 }
 0x420   :  { %v4781_v32 = vsel %vm4452_vm9, %v4686_v33, %v4780_v25  ;;  %v4258_v39 = vsel %vm885_vm0, %v4165_v20, 0.0 }
 0x421   :  { %4229 = vadd.xlane.f32.xlu1 %v4228_v59  ;;  %v4240_v45 = vsel %vm885_vm0, %v4159_v51, 0.0  ;;  %v4789_v59 = vsel %vm4454_vm10, %v4767_v36, %v4788_v53  ;;  %v4782_v14 = vsel %vm4454_vm10, %v4695_v9, %v4781_v32 }
 0x422   :  { %v4790_v30 = vsel %vm4456_vm11, %v4776_v38, %v4789_v59 }
 0x423   :  { %4250 = vadd.xlane.f32.xlu0 %v4249_v34  ;;  %v4704_v34 = vsel %vm4307_vm4, %v4703_v0, %v4699_v6  ;;  %v4796_v57 = vsel %vm1350_vm2, %v4790_v30, 0.0 }
 0x424   :  { %v5377_v61 = vpop.f32.mrf.mxu0  ;;  %v4783_v42 = vsel %vm4456_vm11, %v4704_v34, %v4782_v14 }
 0x425   :  { %4247 = vadd.xlane.f32.xlu1 %v4246_v27  ;;  %v4164_v7 = vmul.f32 %v5377_v61, %v5377_v61  ;;  %v4793_v35 = vsel %vm1350_vm2, %v4783_v42, 0.0 }
 0x426   :  { %v4013_v58 = vpop.f32.mrf.mxu0 }
 0x427   :  { %4244 = vadd.xlane.f32.xlu0 %v4243_v31  ;;  %v4163_v16 = vmul.f32 %v4013_v58, %v4013_v58  ;;  %v4255_v43 = vsel %vm4170_vm3, %v4164_v7, 0.0 }
 0x429   :  { %4241 = vadd.xlane.f32.xlu1 %v4240_v45  ;;  %v4252_v5 = vsel %vm885_vm0, %v4163_v16, 0.0 }
 0x42b   :  { %4256 = vadd.xlane.f32.xlu0 %v4255_v43 }
 0x42d   :  { %4253 = vadd.xlane.f32.xlu1 %v4252_v5 }
 0x42f   :  { %4262 = vadd.xlane.f32.xlu0 %v4261_v12 }
 0x431   :  { %4259 = vadd.xlane.f32.xlu1 %v4258_v39 }
 0x433   :  { %4797 = vadd.xlane.f32.xlu0 %v4796_v57 }
 0x435   :  { %4794 = vadd.xlane.f32.xlu1 %v4793_v35 }
 0x47c   :  { %v4179_v63 = vpop.xlane.xlu0 %4178 }
 0x47d   :  { %v4316_v61 = vrot.slane %v4179_v63, %v5774_v41 }
 0x47e   :  { %v4176_v26 = vpop.xlane.xlu1 %4175 }
 0x47f   :  { %v4312_v13 = vrot.slane %v4176_v26, %v5770_v37 }
 0x480   :  { %v4173_v23 = vpop.xlane.xlu0 %4172 }
 0x481   :  { %v4306_v3 = vrot.slane %v4173_v23, %v5774_v41  ;;  %v4317_v31 = vsel %vm4307_vm4, %v4316_v61, %v4312_v13 }
 0x482   :  { %v4169_v4 = vpop.xlane.xlu1 %4168 }
 0x483   :  { %v4301_v60 = vrot.slane %v4169_v4, %v5770_v37 }
 0x484   :  { %v4191_v18 = vpop.xlane.xlu0 %4190 }
 0x485   :  { %v4308_v1 = vsel %vm4307_vm4, %v4306_v3, %v4301_v60  ;;  %v4334_v2 = vrot.slane %v4191_v18, %v5774_v41 }
 0x486   :  { %v4188_v62 = vpop.xlane.xlu1 %4187  ;;  %v4445_v55 = vsel %vm4444_vm5, %v4317_v31, %v4308_v1 }
 0x487   :  { %v4330_v29 = vrot.slane %v4188_v62, %v5770_v37 }
 0x488   :  { %v4185_v15 = vpop.xlane.xlu0 %4184 }
 0x489   :  { %v4325_v11 = vrot.slane %v4185_v15, %v5774_v41  ;;  %v4335_v56 = vsel %vm4307_vm4, %v4334_v2, %v4330_v29 }
 0x48a   :  { %v4182_v19 = vpop.xlane.xlu1 %4181 }
 0x48b   :  { %v4321_v27 = vrot.slane %v4182_v19, %v5770_v37 }
 0x48c   :  { %v4203_v21 = vpop.xlane.xlu0 %4202 }
 0x48d   :  { %v4326_v10 = vsel %vm4307_vm4, %v4325_v11, %v4321_v27  ;;  %v4352_v46 = vrot.slane %v4203_v21, %v5774_v41 }
 0x48e   :  { %v4200_v51 = vpop.xlane.xlu1 %4199  ;;  %v4447_v58 = vsel %vm4446_vm6, %v4326_v10, %v4445_v55 }
 0x48f   :  { %v4348_v43 = vrot.slane %v4200_v51, %v5770_v37  ;;  %v4449_v48 = vsel %vm4448_vm7, %v4335_v56, %v4447_v58 }
 0x490   :  { %v4197_v17 = vpop.xlane.xlu0 %4196 }
 0x491   :  { %v4343_v49 = vrot.slane %v4197_v17, %v5774_v41  ;;  %v4353_v0 = vsel %vm4307_vm4, %v4352_v46, %v4348_v43 }
 0x492   :  { %v4194_v24 = vpop.xlane.xlu1 %4193 }
 0x493   :  { %v4339_v7 = vrot.slane %v4194_v24, %v5770_v37 }
 0x494   :  { %v4215_v50 = vpop.xlane.xlu0 %4214 }
 0x495   :  { %v4344_v45 = vsel %vm4307_vm4, %v4343_v49, %v4339_v7  ;;  %v4370_v54 = vrot.slane %v4215_v50, %v5774_v41 }
 0x496   :  { %v4212_v16 = vpop.xlane.xlu1 %4211  ;;  %v4451_v47 = vsel %vm4450_vm8, %v4344_v45, %v4449_v48 }
 0x497   :  { %v4366_v22 = vrot.slane %v4212_v16, %v5770_v37  ;;  %v4453_v36 = vsel %vm4452_vm9, %v4353_v0, %v4451_v47 }
 0x498   :  { %v4209_v28 = vpop.xlane.xlu0 %4208 }
 0x499   :  { %v4361_v8 = vrot.slane %v4209_v28, %v5774_v41  ;;  %v4371_v5 = vsel %vm4307_vm4, %v4370_v54, %v4366_v22 }
 0x49a   :  { %v4206_v52 = vpop.xlane.xlu1 %4205 }
 0x49b   :  { %v4357_v44 = vrot.slane %v4206_v52, %v5770_v37 }
 0x49c   :  { %v4227_v33 = vpop.xlane.xlu0 %4226 }
 0x49d   :  { %v4362_v6 = vsel %vm4307_vm4, %v4361_v8, %v4357_v44  ;;  %v4388_v23 = vrot.slane %v4227_v33, %v5774_v41 }
 0x49e   :  { %v4224_v20 = vpop.xlane.xlu1 %4223  ;;  %v4455_v12 = vsel %vm4454_vm10, %v4362_v6, %v4453_v36 }
 0x49f   :  { %v4457_v38 = vsel %vm4456_vm11, %v4371_v5, %v4455_v12  ;;  %v4384_v57 = vrot.slane %v4224_v20, %v5770_v37 }
 0x4a0   :  { %v4221_v40 = vpop.xlane.xlu0 %4220  ;;  %v4467_v9 = vsel %vm885_vm0, %v4457_v38, 0.0 }
 0x4a1   :  { %4468 = vadd.xlane.f32.xlu1 %v4467_v9  ;;  %v4379_v35 = vrot.slane %v4221_v40, %v5774_v41  ;;  %v4389_v15 = vsel %vm4307_vm4, %v4388_v23, %v4384_v57 }
 0x4a2   :  { %v4218_v53 = vpop.xlane.xlu1 %4217 }
 0x4a3   :  { %v4375_v39 = vrot.slane %v4218_v53, %v5770_v37 }
 0x4a4   :  { %v4239_v25 = vpop.xlane.xlu0 %4238 }
 0x4a5   :  { %v4380_v4 = vsel %vm4307_vm4, %v4379_v35, %v4375_v39  ;;  %v4406_v13 = vrot.slane %v4239_v25, %v5774_v41 }
 0x4a6   :  { %v4236_v59 = vpop.xlane.xlu1 %4235  ;;  %v4458_v60 = vsel %vm4444_vm5, %v4389_v15, %v4380_v4 }
 0x4a7   :  { %v4402_v19 = vrot.slane %v4236_v59, %v5770_v37 }
 0x4a8   :  { %v4233_v34 = vpop.xlane.xlu0 %4232 }
 0x4a9   :  { %v4397_v63 = vrot.slane %v4233_v34, %v5774_v41  ;;  %v4407_v61 = vsel %vm4307_vm4, %v4406_v13, %v4402_v19 }
 0x4aa   :  { %v4230_v30 = vpop.xlane.xlu1 %4229 }
 0x4ab   :  { %v4393_v14 = vrot.slane %v4230_v30, %v5770_v37 }
 0x4ac   :  { %v4251_v32 = vpop.xlane.xlu0 %4250 }
 0x4ad   :  { %v4398_v18 = vsel %vm4307_vm4, %v4397_v63, %v4393_v14  ;;  %v4424_v29 = vrot.slane %v4251_v32, %v5774_v41 }
 0x4ae   :  { %v4248_v42 = vpop.xlane.xlu1 %4247  ;;  %v4459_v3 = vsel %vm4446_vm6, %v4398_v18, %v4458_v60 }
 0x4af   :  { %v4420_v1 = vrot.slane %v4248_v42, %v5770_v37  ;;  %v4460_v10 = vsel %vm4448_vm7, %v4407_v61, %v4459_v3 }
 0x4b0   :  { %v4245_v26 = vpop.xlane.xlu0 %4244 }
 0x4b1   :  { %v4415_v51 = vrot.slane %v4245_v26, %v5774_v41  ;;  %v4425_v2 = vsel %vm4307_vm4, %v4424_v29, %v4420_v1 }
 0x4b2   :  { %v4242_v62 = vpop.xlane.xlu1 %4241 }
 0x4b3   :  { %v4411_v21 = vrot.slane %v4242_v62, %v5770_v37 }
 0x4b4   :  { %v4257_v27 = vpop.xlane.xlu0 %4256 }
 0x4b5   :  { %v4416_v17 = vsel %vm4307_vm4, %v4415_v51, %v4411_v21  ;;  %v4433_v7 = vrot.slane %v4257_v27, %v5774_v41 }
 0x4b6   :  { %v4254_v11 = vpop.xlane.xlu1 %4253  ;;  %v4461_v50 = vsel %vm4450_vm8, %v4416_v17, %v4460_v10 }
 0x4b7   :  { %v4429_v24 = vrot.slane %v4254_v11, %v5770_v37  ;;  %v4462_v45 = vsel %vm4452_vm9, %v4425_v2, %v4461_v50 }
 0x4b8   :  { %v4263_v31 = vpop.xlane.xlu0 %4262 }
 0x4b9   :  { %v4434_v55 = vsel %vm4307_vm4, %v4433_v7, %v4429_v24  ;;  %v4442_v58 = vrot.slane %v4263_v31, %v5774_v41 }
 0x4ba   :  { %v4260_v49 = vpop.xlane.xlu1 %4259  ;;  %v4463_v43 = vsel %vm4454_vm10, %v4434_v55, %v4462_v45 }
 0x4bb   :  { %v4438_v16 = vrot.slane %v4260_v49, %v5770_v37 }
 0x4bc   :  { %v4798_v0 = vpop.xlane.xlu0 %4797 }
 0x4bd   :  { %v4443_v56 = vsel %vm4307_vm4, %v4442_v58, %v4438_v16  ;;  %v4800_v33 = vmul.f32 2.0, %v4798_v0 }
 0x4be   :  { %v4464_v28 = vsel %vm4456_vm11, %v4443_v56, %v4463_v43  ;;  %v4795_v46 = vpop.xlane.xlu1 %4794 }
 0x4bf   :  { %v4470_v48 = vsel %vm885_vm0, %v4464_v28, 0.0  ;;  %v4799_v22 = vmul.f32 2.0, %v4795_v46  ;;  %vm4835_vm0 = vcmask 122880  }
 0x4c0   :  { %4471 = vadd.xlane.f32.xlu0 %v4470_v48 }
 0x52a   :  { %v4469_v47 = vpop.xlane.xlu1 %4468 }
 0x52b   :  { %v4801_v52 = vsub.f32 %v4469_v47, %v4799_v22 }
 0x52d   :  { %v4803_v8 = vadd.f32 10.0, %v4801_v52 }
 0x52f   :  { %v4805_v44 = vmax.f32 %v4803_v8, 0.0 }
 0x531   :  { %v4807_v54 = vadd.f32 1e-10, %v4805_v44 }
 0x533   :  { %5587 = vrsqrt.f32 %v4807_v54  ;;  %vm4811_vm12 = vcmp.eq.f32.partialorder %v4807_v54, inf  ;;  %v4814_v25 = vand.u32 2147483648, %v4807_v54  ;;  %vm4813_vm13 = vcmp.eq.f32.partialorder %v4807_v54, 0.0 }
 0x540   :  { %v5588_v38 = vpop.eup %5587 }
 0x541   :  { %v4810_v40 = vmul.f32 %v5588_v38, %v4807_v54 }
 0x543   :  { %v4812_v9 = vsel %vm4811_vm12, %v4807_v54, %v4810_v40 }
 0x544   :  { %v4815_v34 = vsel %vm4813_vm13, %v4814_v25, %v4812_v9 }
 0x545   :  { %v4828_v14 = vrot.slane %v4815_v34, %v5770_v37 }
 0x549   :  { %v4472_v6 = vpop.xlane.xlu0 %4471 }
 0x54a   :  { %v4802_v36 = vsub.f32 %v4472_v6, %v4800_v33 }
 0x54c   :  { %v4804_v20 = vadd.f32 10.0, %v4802_v36 }
 0x54e   :  { %v4806_v5 = vmax.f32 %v4804_v20, 0.0 }
 0x550   :  { %v4808_v12 = vadd.f32 1e-10, %v4806_v5 }
 0x552   :  { %5589 = vrsqrt.f32 %v4808_v12  ;;  %vm4818_vm14 = vcmp.eq.f32.partialorder %v4808_v12, inf  ;;  %v4821_v30 = vand.u32 2147483648, %v4808_v12  ;;  %vm4820_vm15 = vcmp.eq.f32.partialorder %v4808_v12, 0.0 }
 0x55f   :  { %v5590_v53 = vpop.eup %5589 }
 0x560   :  { %v4817_v59 = vmul.f32 %v5590_v53, %v4808_v12 }
 0x562   :  { %v4819_v32 = vsel %vm4818_vm14, %v4808_v12, %v4817_v59 }
 0x563   :  { %v4822_v39 = vsel %vm4820_vm15, %v4821_v30, %v4819_v32 }
 0x564   :  { %v4832_v42 = vrot.slane %v4822_v39, %v5774_v41 }
 0x566   :  { %v4833_v57 = vsel %vm4307_vm4, %v4832_v42, %v4828_v14 }
 0x567   :  { %4836 = vst.msk [vmem:[#allocation7] sm:$0x1] %vm4835_vm0, %v4833_v57 }
 0x568   :  { %5658 = shalt.err (!%p5655_p0)
}
 0x569   :  { %4848 = dma.vmem_to_hbm [thread:$0]  %s4846_s14, 16, %s6901_s5, [#allocation4]  }
 0x56a   :  { %5671 = dma.done.wait [#allocation4], 16  }
 0x56b   :  { %5672 = vsyncadd [#allocation4], 4294967280 }
 0x56c   :  { %4854 = vsyncpa [#allocation3], 1 }
 0x56d   :  { %4855 = vsyncpa [#allocation6], 1 }
 0x56e   :  { %4856 = vsyncpa [#allocation4], 1 }

</bundles_post_ra>
